<compile_context>
chip_gen: v7x
topology: tpu7x:2x2x1
jax: 0.10.0
libtpu: 0.0.40
codegen_flags: <defaults>
</compile_context>

<pallas_src>
import jax
import jax.numpy as jnp
from jax.experimental import pallas as pl
from jax.experimental.pallas import tpu as pltpu

START_TAG = "<START>"
STOP_TAG = "<STOP>"
tagToIndex = {"B": 0, "I": 1, "O": 2, START_TAG: 3, STOP_TAG: 4}
START_IDX = tagToIndex[START_TAG]
STOP_IDX = tagToIndex[STOP_TAG]


# ---------------------------------------------------------------------------
# Fused kernel: BiLSTM + hidden->tag linear + Viterbi DP + backtrack
# ---------------------------------------------------------------------------
def bilstm_crf_kernel(emb_ref,                    # (T, E)
                      w_in_ref, b_in_ref,         # (E, 8*Hh), (1, 8*Hh)  [fwd | bwd]
                      whhT_f_ref, whhT_b_ref,     # (Hh, 4*Hh) each
                      h0_ref, c0_ref,             # (2, Hh)  row 0 = fwd, row 1 = bwd
                      wtagT_ref, btag_ref,        # (H, K), (1, K)
                      trans_ref,                  # (K, K)
                      feat_ref, score_ref, path_ref):  # out: (T,K) f32, (1,1) f32, (1,T) i32
    T = emb_ref.shape[0]
    Hh = whhT_f_ref.shape[0]
    K = trans_ref.shape[0]
    G = 4 * Hh

    # ---- input projection for both directions, batched over T (one MXU pass) ----
    gates_in = (jnp.dot(emb_ref[...], w_in_ref[...],
                        preferred_element_type=jnp.float32)
                + b_in_ref[...])                     # (T, 8*Hh), gate order i,f,g,o
    gates_f_all = gates_in[:, :G]                    # (T, 4*Hh)
    gates_b_all = gates_in[:, G:]                    # (T, 4*Hh)

    whhT_f = whhT_f_ref[...]
    whhT_b = whhT_b_ref[...]

    def cell(pre, h, c, whhT):
        gates = pre + jnp.dot(h, whhT, preferred_element_type=jnp.float32)  # (1, 4*Hh)
        s = jax.nn.sigmoid(gates)       # one EUP pass for i, f, o
        th = jnp.tanh(gates)            # one EUP pass for g
        i = s[:, 0 * Hh:1 * Hh]
        f = s[:, 1 * Hh:2 * Hh]
        g = th[:, 2 * Hh:3 * Hh]
        o = s[:, 3 * Hh:4 * Hh]
        c_new = f * c + i * g
        h_new = o * jnp.tanh(c_new)
        return h_new, c_new

    # recurrence state lives in vregs (loop carry), never in VMEM scratch
    hf = h0_ref[0:1, :]
    cf = c0_ref[0:1, :]
    hb = h0_ref[1:2, :]
    cb = c0_ref[1:2, :]

    outf = [None] * T
    outb = [None] * T
    # interleave the two independent recurrences so their serial chains hide
    # each other's matmul/EUP latency (T is small & static -> fully unrolled)
    for t in range(T):
        tb = T - 1 - t
        hf, cf = cell(gates_f_all[t:t + 1, :], hf, cf, whhT_f)
        hb, cb = cell(gates_b_all[tb:tb + 1, :], hb, cb, whhT_b)
        outf[t] = hf
        outb[tb] = hb

    out_f = jnp.concatenate(outf, axis=0)            # (T, Hh)
    out_b = jnp.concatenate(outb, axis=0)            # (T, Hh)

    # hidden -> tag linear layer: concat(h_f, h_b) @ W.T + b
    # (split matmuls avoid an in-kernel lane concat)
    feats = (jnp.dot(out_f, wtagT_ref[0:Hh, :], preferred_element_type=jnp.float32)
             + jnp.dot(out_b, wtagT_ref[Hh:, :], preferred_element_type=jnp.float32)
             + btag_ref[...])                        # (T, K)
    feat_ref[...] = feats                            # single bulk store

    # ---- Viterbi DP (state + backpointers stay in vregs) ----
    lane_k = jax.lax.broadcasted_iota(jnp.int32, (1, K), 1)
    prev_k = jax.lax.broadcasted_iota(jnp.int32, (K, K), 1)
    lane_t = jax.lax.broadcasted_iota(jnp.int32, (1, T), 1)

    trans = trans_ref[...]
    fwd = jnp.where(lane_k == START_IDX, 0.0, -10000.0)          # (1, K)
    bptrs = [None] * T
    for t in range(T):
        v = trans + fwd                                           # v[next, prev]
        m = jnp.max(v, axis=1, keepdims=True)                     # (K, 1)
        bp = jnp.min(jnp.where(v == m, prev_k, K),
                     axis=1, keepdims=True)                        # (K, 1) first argmax
        bptrs[t] = bp.reshape(1, K)                                # (1, K) int32
        fwd = m.reshape(1, K) + feats[t:t + 1, :]

    terminal = fwd + trans[STOP_IDX:STOP_IDX + 1, :]              # (1, K)
    tmax = jnp.max(terminal, axis=1, keepdims=True)               # (1, 1)
    best = jnp.min(jnp.where(terminal == tmax, lane_k, K),
                   axis=1, keepdims=True)                          # (1, 1) int32
    score_ref[...] = tmax

    # ---- in-kernel backtrack (vectorized one-hot select, no scalar gathers) ----
    cur = best                                                     # (1, 1) int32
    path = jnp.where(lane_t == (T - 1), cur, jnp.zeros((1, T), jnp.int32))
    for t in range(T - 1, 0, -1):
        cur = jnp.sum(jnp.where(lane_k == cur, bptrs[t], 0),
                      axis=1, keepdims=True)                       # bptr[t, cur]
        path = jnp.where(lane_t == (t - 1), cur, path)
    # TODO(synk): original asserts bptrs[0][path[0]] == START_TAG; skipped (device-side assert).
    path_ref[...] = path                                           # single bulk store


# ---------------------------------------------------------------------------
# Parameter init (deterministic, shapes from BiLSTM_CRF.__init__)
# ---------------------------------------------------------------------------
def init_params(key, vocab_size, embedding_dim, hidden_dim, tagset_size):
    Hh = hidden_dim // 2
    ks = jax.random.split(key, 16)
    k_lstm = 1.0 / (Hh ** 0.5)
    k_lin = 1.0 / (hidden_dim ** 0.5)

    def u(kk, shape, bound):
        return jax.random.uniform(kk, shape, jnp.float32, -bound, bound)

    trans = jax.random.normal(ks[11], (tagset_size, tagset_size), jnp.float32)
    trans = trans.at[START_IDX, :].set(-10000.0)
    trans = trans.at[:, STOP_IDX].set(-10000.0)

    return dict(
        embed=jax.random.normal(ks[0], (vocab_size, embedding_dim), jnp.float32),
        w_ih_f=u(ks[1], (4 * Hh, embedding_dim), k_lstm),
        w_hh_f=u(ks[2], (4 * Hh, Hh), k_lstm),
        b_ih_f=u(ks[3], (4 * Hh,), k_lstm),
        b_hh_f=u(ks[4], (4 * Hh,), k_lstm),
        w_ih_b=u(ks[5], (4 * Hh, embedding_dim), k_lstm),
        w_hh_b=u(ks[6], (4 * Hh, Hh), k_lstm),
        b_ih_b=u(ks[7], (4 * Hh,), k_lstm),
        b_hh_b=u(ks[8], (4 * Hh,), k_lstm),
        w_tag=u(ks[9], (tagset_size, hidden_dim), k_lin),
        b_tag=u(ks[10], (tagset_size,), k_lin),
        transitions=trans,
        h0=jax.random.normal(ks[12], (2, Hh), jnp.float32),   # initHiddenLayer() (batch squeezed)
        c0=jax.random.normal(ks[13], (2, Hh), jnp.float32),
        hidden_dim=hidden_dim,
    )


def prepare_params(params):
    """Materialize kernel-ready layouts once (transposes, bias sums, concats)."""
    return dict(
        embed=params["embed"],
        w_in=jnp.concatenate([params["w_ih_f"].T, params["w_ih_b"].T], axis=1),   # (E, 8*Hh)
        b_in=jnp.concatenate([params["b_ih_f"] + params["b_hh_f"],
                              params["b_ih_b"] + params["b_hh_b"]])[None, :],      # (1, 8*Hh)
        whhT_f=params["w_hh_f"].T,
        whhT_b=params["w_hh_b"].T,
        h0=params["h0"],
        c0=params["c0"],
        wtagT=params["w_tag"].T,
        btag=params["b_tag"][None, :],
        transitions=params["transitions"],
    )


# ---------------------------------------------------------------------------
# Wrapper: BiLSTM_CRF.forward(sentence) -> (viterbi score, best tag sequence)
# ---------------------------------------------------------------------------
@jax.jit
def bilstm_crf_forward(prep, sentence):
    T = sentence.shape[0]
    K = prep["transitions"].shape[0]

    emb = prep["embed"][sentence]                     # (T, E) gather, fused by XLA
    vmem = pl.BlockSpec(memory_space=pltpu.MemorySpace.VMEM)

    feats, score, path = pl.pallas_call(
        bilstm_crf_kernel,
        out_shape=(jax.ShapeDtypeStruct((T, K), jnp.float32),
                   jax.ShapeDtypeStruct((1, 1), jnp.float32),
                   jax.ShapeDtypeStruct((1, T), jnp.int32)),
        in_specs=[vmem] * 10,
        out_specs=(vmem, vmem, vmem),
    )(emb, prep["w_in"], prep["b_in"], prep["whhT_f"], prep["whhT_b"],
      prep["h0"], prep["c0"], prep["wtagT"], prep["btag"], prep["transitions"])

    return score[0, 0], path[0], feats


# ---------------------------------------------------------------------------
# Pure-JAX reference (for verification)
# ---------------------------------------------------------------------------
def ref_forward(params, sentence):
    H = params["hidden_dim"]
    Hh = H // 2
    T = sentence.shape[0]
    emb = params["embed"][sentence]

    def run_dir(wih, whh, b, h, c, reverse):
        outs = [None] * T
        order = range(T - 1, -1, -1) if reverse else range(T)
        for t in order:
            g = wih @ emb[t] + whh @ h + b
            i = jax.nn.sigmoid(g[0:Hh]); f = jax.nn.sigmoid(g[Hh:2 * Hh])
            gg = jnp.tanh(g[2 * Hh:3 * Hh]); o = jax.nn.sigmoid(g[3 * Hh:4 * Hh])
            c = f * c + i * gg
            h = o * jnp.tanh(c)
            outs[t] = h
        return jnp.stack(outs)

    out_f = run_dir(params["w_ih_f"], params["w_hh_f"], params["b_ih_f"] + params["b_hh_f"],
                    params["h0"][0], params["c0"][0], reverse=False)
    out_b = run_dir(params["w_ih_b"], params["w_hh_b"], params["b_ih_b"] + params["b_hh_b"],
                    params["h0"][1], params["c0"][1], reverse=True)
    feats = jnp.concatenate([out_f, out_b], axis=1) @ params["w_tag"].T + params["b_tag"]

    trans = params["transitions"]
    K = trans.shape[0]
    fwd = jnp.full((K,), -10000.0).at[START_IDX].set(0.0)
    bptrs = []
    for t in range(T):
        v = trans + fwd[None, :]
        bp = jnp.argmax(v, axis=1)
        fwd = jnp.max(v, axis=1) + feats[t]
        bptrs.append(bp)
    terminal = fwd + trans[STOP_IDX]
    best = int(jnp.argmax(terminal))
    score = terminal[best]
    path = [best]
    for bp in reversed(bptrs):
        best = int(bp[best])
        path.append(best)
    assert path.pop() == START_IDX
    path.reverse()
    return score, jnp.array(path, dtype=jnp.int32), feats


if __name__ == "__main__":
    vocab_size, embedding_dim, hidden_dim = 12, 8, 8
    tagset_size = len(tagToIndex)
    T = 8

    key = jax.random.PRNGKey(0)
    pkey, skey = jax.random.split(key)
    params = init_params(pkey, vocab_size, embedding_dim, hidden_dim, tagset_size)
    prep = prepare_params(params)
    sentence = jax.random.randint(skey, (T,), 0, vocab_size, dtype=jnp.int32)

    score, tag_seq, feats = bilstm_crf_forward(prep, sentence)
    jax.block_until_ready((score, tag_seq, feats))

    ref_score, ref_tags, ref_feats = ref_forward(params, sentence)
    assert jnp.allclose(feats, ref_feats, atol=1e-3, rtol=1e-3), "feature mismatch"
    assert jnp.allclose(score, ref_score, atol=1e-3, rtol=1e-3), "score mismatch"
    assert [int(x) for x in tag_seq] == [int(x) for x in ref_tags], "tag path mismatch"

    print("KERNEL_OK")
</pallas_src>

<mosaic_0001>
module attributes {stable_mosaic.version = 11 : i64} {
  func.func @bilstm_crf_kernel(%arg0: memref<8x8xf32, #tpu.memory_space<vmem>>, %arg1: memref<8x32xf32, #tpu.memory_space<vmem>>, %arg2: memref<1x32xf32, #tpu.memory_space<vmem>>, %arg3: memref<4x16xf32, #tpu.memory_space<vmem>>, %arg4: memref<4x16xf32, #tpu.memory_space<vmem>>, %arg5: memref<2x4xf32, #tpu.memory_space<vmem>>, %arg6: memref<2x4xf32, #tpu.memory_space<vmem>>, %arg7: memref<8x5xf32, #tpu.memory_space<vmem>>, %arg8: memref<1x5xf32, #tpu.memory_space<vmem>>, %arg9: memref<5x5xf32, #tpu.memory_space<vmem>>, %arg10: memref<8x5xf32, #tpu.memory_space<vmem>>, %arg11: memref<1x1xf32, #tpu.memory_space<vmem>>, %arg12: memref<1x8xi32, #tpu.memory_space<vmem>>) attributes {dimension_semantics = [], scalar_prefetch = 0 : i64, scratch_operands = 0 : i64, tpu.core_type = #tpu.core_type<tc>} {
    %c0 = arith.constant 0 : index
    %c0_0 = arith.constant 0 : index
    %0 = vector.load %arg0[%c0, %c0_0] : memref<8x8xf32, #tpu.memory_space<vmem>>, vector<8x8xf32>
    %c0_1 = arith.constant 0 : index
    %c0_2 = arith.constant 0 : index
    %1 = vector.load %arg1[%c0_1, %c0_2] : memref<8x32xf32, #tpu.memory_space<vmem>>, vector<8x32xf32>
    %cst = arith.constant dense<0.000000e+00> : vector<8x32xf32>
    %2 = tpu.matmul %0, %1, %cst {dimension_numbers = #tpu.dot_dimension_numbers<[1], [0], [0], [1], [0, 0, 1, 1], [], []>} : vector<8x8xf32>, vector<8x32xf32>, vector<8x32xf32> -> vector<8x32xf32>
    %c0_3 = arith.constant 0 : index
    %c0_4 = arith.constant 0 : index
    %3 = vector.load %arg2[%c0_3, %c0_4] : memref<1x32xf32, #tpu.memory_space<vmem>>, vector<1x32xf32>
    %4 = vector.broadcast %3 : vector<1x32xf32> to vector<8x32xf32>
    %5 = arith.addf %2, %4 : vector<8x32xf32>
    %6 = vector.extract_strided_slice %5 {offsets = [0, 0], sizes = [8, 16], strides = [1, 1]} : vector<8x32xf32> to vector<8x16xf32>
    %7 = vector.extract_strided_slice %5 {offsets = [0, 16], sizes = [8, 16], strides = [1, 1]} : vector<8x32xf32> to vector<8x16xf32>
    %c0_5 = arith.constant 0 : index
    %c0_6 = arith.constant 0 : index
    %8 = vector.load %arg3[%c0_5, %c0_6] : memref<4x16xf32, #tpu.memory_space<vmem>>, vector<4x16xf32>
    %c0_7 = arith.constant 0 : index
    %c0_8 = arith.constant 0 : index
    %9 = vector.load %arg4[%c0_7, %c0_8] : memref<4x16xf32, #tpu.memory_space<vmem>>, vector<4x16xf32>
    %c0_9 = arith.constant 0 : index
    %c0_10 = arith.constant 0 : index
    %10 = vector.load %arg5[%c0_9, %c0_10] : memref<2x4xf32, #tpu.memory_space<vmem>>, vector<1x4xf32>
    %c0_11 = arith.constant 0 : index
    %c0_12 = arith.constant 0 : index
    %11 = vector.load %arg6[%c0_11, %c0_12] : memref<2x4xf32, #tpu.memory_space<vmem>>, vector<1x4xf32>
    %c1 = arith.constant 1 : index
    %c0_13 = arith.constant 0 : index
    %12 = vector.load %arg5[%c1, %c0_13] : memref<2x4xf32, #tpu.memory_space<vmem>>, vector<1x4xf32>
    %c1_14 = arith.constant 1 : index
    %c0_15 = arith.constant 0 : index
    %13 = vector.load %arg6[%c1_14, %c0_15] : memref<2x4xf32, #tpu.memory_space<vmem>>, vector<1x4xf32>
    %14 = vector.extract_strided_slice %6 {offsets = [0, 0], sizes = [1, 16], strides = [1, 1]} : vector<8x16xf32> to vector<1x16xf32>
    %cst_16 = arith.constant dense<0.000000e+00> : vector<1x16xf32>
    %15 = tpu.matmul %10, %8, %cst_16 {dimension_numbers = #tpu.dot_dimension_numbers<[1], [0], [0], [1], [0, 0, 1, 1], [], []>} : vector<1x4xf32>, vector<4x16xf32>, vector<1x16xf32> -> vector<1x16xf32>
    %16 = arith.addf %14, %15 : vector<1x16xf32>
    %17 = arith.negf %16 : vector<1x16xf32>
    %18 = math.exp %17 : vector<1x16xf32>
    %cst_17 = arith.constant 1.000000e+00 : f32
    %19 = vector.broadcast %cst_17 : f32 to vector<1x16xf32>
    %20 = arith.addf %19, %18 : vector<1x16xf32>
    %21 = arith.divf %19, %20 : vector<1x16xf32>
    %22 = math.tanh %16 : vector<1x16xf32>
    %23 = vector.extract_strided_slice %21 {offsets = [0, 0], sizes = [1, 4], strides = [1, 1]} : vector<1x16xf32> to vector<1x4xf32>
    %24 = vector.extract_strided_slice %21 {offsets = [0, 4], sizes = [1, 4], strides = [1, 1]} : vector<1x16xf32> to vector<1x4xf32>
    %25 = vector.extract_strided_slice %22 {offsets = [0, 8], sizes = [1, 4], strides = [1, 1]} : vector<1x16xf32> to vector<1x4xf32>
    %26 = vector.extract_strided_slice %21 {offsets = [0, 12], sizes = [1, 4], strides = [1, 1]} : vector<1x16xf32> to vector<1x4xf32>
    %27 = arith.mulf %24, %11 : vector<1x4xf32>
    %28 = arith.mulf %23, %25 : vector<1x4xf32>
    %29 = arith.addf %27, %28 : vector<1x4xf32>
    %30 = math.tanh %29 : vector<1x4xf32>
    %31 = arith.mulf %26, %30 : vector<1x4xf32>
    %32 = vector.extract_strided_slice %7 {offsets = [7, 0], sizes = [1, 16], strides = [1, 1]} : vector<8x16xf32> to vector<1x16xf32>
    %cst_18 = arith.constant dense<0.000000e+00> : vector<1x16xf32>
    %33 = tpu.matmul %12, %9, %cst_18 {dimension_numbers = #tpu.dot_dimension_numbers<[1], [0], [0], [1], [0, 0, 1, 1], [], []>} : vector<1x4xf32>, vector<4x16xf32>, vector<1x16xf32> -> vector<1x16xf32>
    %34 = arith.addf %32, %33 : vector<1x16xf32>
    %35 = arith.negf %34 : vector<1x16xf32>
    %36 = math.exp %35 : vector<1x16xf32>
    %cst_19 = arith.constant 1.000000e+00 : f32
    %37 = vector.broadcast %cst_19 : f32 to vector<1x16xf32>
    %38 = arith.addf %37, %36 : vector<1x16xf32>
    %39 = arith.divf %37, %38 : vector<1x16xf32>
    %40 = math.tanh %34 : vector<1x16xf32>
    %41 = vector.extract_strided_slice %39 {offsets = [0, 0], sizes = [1, 4], strides = [1, 1]} : vector<1x16xf32> to vector<1x4xf32>
    %42 = vector.extract_strided_slice %39 {offsets = [0, 4], sizes = [1, 4], strides = [1, 1]} : vector<1x16xf32> to vector<1x4xf32>
    %43 = vector.extract_strided_slice %40 {offsets = [0, 8], sizes = [1, 4], strides = [1, 1]} : vector<1x16xf32> to vector<1x4xf32>
    %44 = vector.extract_strided_slice %39 {offsets = [0, 12], sizes = [1, 4], strides = [1, 1]} : vector<1x16xf32> to vector<1x4xf32>
    %45 = arith.mulf %42, %13 : vector<1x4xf32>
    %46 = arith.mulf %41, %43 : vector<1x4xf32>
    %47 = arith.addf %45, %46 : vector<1x4xf32>
    %48 = math.tanh %47 : vector<1x4xf32>
    %49 = arith.mulf %44, %48 : vector<1x4xf32>
    %50 = vector.extract_strided_slice %6 {offsets = [1, 0], sizes = [1, 16], strides = [1, 1]} : vector<8x16xf32> to vector<1x16xf32>
    %cst_20 = arith.constant dense<0.000000e+00> : vector<1x16xf32>
    %51 = tpu.matmul %31, %8, %cst_20 {dimension_numbers = #tpu.dot_dimension_numbers<[1], [0], [0], [1], [0, 0, 1, 1], [], []>} : vector<1x4xf32>, vector<4x16xf32>, vector<1x16xf32> -> vector<1x16xf32>
    %52 = arith.addf %50, %51 : vector<1x16xf32>
    %53 = arith.negf %52 : vector<1x16xf32>
    %54 = math.exp %53 : vector<1x16xf32>
    %cst_21 = arith.constant 1.000000e+00 : f32
    %55 = vector.broadcast %cst_21 : f32 to vector<1x16xf32>
    %56 = arith.addf %55, %54 : vector<1x16xf32>
    %57 = arith.divf %55, %56 : vector<1x16xf32>
    %58 = math.tanh %52 : vector<1x16xf32>
    %59 = vector.extract_strided_slice %57 {offsets = [0, 0], sizes = [1, 4], strides = [1, 1]} : vector<1x16xf32> to vector<1x4xf32>
    %60 = vector.extract_strided_slice %57 {offsets = [0, 4], sizes = [1, 4], strides = [1, 1]} : vector<1x16xf32> to vector<1x4xf32>
    %61 = vector.extract_strided_slice %58 {offsets = [0, 8], sizes = [1, 4], strides = [1, 1]} : vector<1x16xf32> to vector<1x4xf32>
    %62 = vector.extract_strided_slice %57 {offsets = [0, 12], sizes = [1, 4], strides = [1, 1]} : vector<1x16xf32> to vector<1x4xf32>
    %63 = arith.mulf %60, %29 : vector<1x4xf32>
    %64 = arith.mulf %59, %61 : vector<1x4xf32>
    %65 = arith.addf %63, %64 : vector<1x4xf32>
    %66 = math.tanh %65 : vector<1x4xf32>
    %67 = arith.mulf %62, %66 : vector<1x4xf32>
    %68 = vector.extract_strided_slice %7 {offsets = [6, 0], sizes = [1, 16], strides = [1, 1]} : vector<8x16xf32> to vector<1x16xf32>
    %cst_22 = arith.constant dense<0.000000e+00> : vector<1x16xf32>
    %69 = tpu.matmul %49, %9, %cst_22 {dimension_numbers = #tpu.dot_dimension_numbers<[1], [0], [0], [1], [0, 0, 1, 1], [], []>} : vector<1x4xf32>, vector<4x16xf32>, vector<1x16xf32> -> vector<1x16xf32>
    %70 = arith.addf %68, %69 : vector<1x16xf32>
    %71 = arith.negf %70 : vector<1x16xf32>
    %72 = math.exp %71 : vector<1x16xf32>
    %cst_23 = arith.constant 1.000000e+00 : f32
    %73 = vector.broadcast %cst_23 : f32 to vector<1x16xf32>
    %74 = arith.addf %73, %72 : vector<1x16xf32>
    %75 = arith.divf %73, %74 : vector<1x16xf32>
    %76 = math.tanh %70 : vector<1x16xf32>
    %77 = vector.extract_strided_slice %75 {offsets = [0, 0], sizes = [1, 4], strides = [1, 1]} : vector<1x16xf32> to vector<1x4xf32>
    %78 = vector.extract_strided_slice %75 {offsets = [0, 4], sizes = [1, 4], strides = [1, 1]} : vector<1x16xf32> to vector<1x4xf32>
    %79 = vector.extract_strided_slice %76 {offsets = [0, 8], sizes = [1, 4], strides = [1, 1]} : vector<1x16xf32> to vector<1x4xf32>
    %80 = vector.extract_strided_slice %75 {offsets = [0, 12], sizes = [1, 4], strides = [1, 1]} : vector<1x16xf32> to vector<1x4xf32>
    %81 = arith.mulf %78, %47 : vector<1x4xf32>
    %82 = arith.mulf %77, %79 : vector<1x4xf32>
    %83 = arith.addf %81, %82 : vector<1x4xf32>
    %84 = math.tanh %83 : vector<1x4xf32>
    %85 = arith.mulf %80, %84 : vector<1x4xf32>
    %86 = vector.extract_strided_slice %6 {offsets = [2, 0], sizes = [1, 16], strides = [1, 1]} : vector<8x16xf32> to vector<1x16xf32>
    %cst_24 = arith.constant dense<0.000000e+00> : vector<1x16xf32>
    %87 = tpu.matmul %67, %8, %cst_24 {dimension_numbers = #tpu.dot_dimension_numbers<[1], [0], [0], [1], [0, 0, 1, 1], [], []>} : vector<1x4xf32>, vector<4x16xf32>, vector<1x16xf32> -> vector<1x16xf32>
    %88 = arith.addf %86, %87 : vector<1x16xf32>
    %89 = arith.negf %88 : vector<1x16xf32>
    %90 = math.exp %89 : vector<1x16xf32>
    %cst_25 = arith.constant 1.000000e+00 : f32
    %91 = vector.broadcast %cst_25 : f32 to vector<1x16xf32>
    %92 = arith.addf %91, %90 : vector<1x16xf32>
    %93 = arith.divf %91, %92 : vector<1x16xf32>
    %94 = math.tanh %88 : vector<1x16xf32>
    %95 = vector.extract_strided_slice %93 {offsets = [0, 0], sizes = [1, 4], strides = [1, 1]} : vector<1x16xf32> to vector<1x4xf32>
    %96 = vector.extract_strided_slice %93 {offsets = [0, 4], sizes = [1, 4], strides = [1, 1]} : vector<1x16xf32> to vector<1x4xf32>
    %97 = vector.extract_strided_slice %94 {offsets = [0, 8], sizes = [1, 4], strides = [1, 1]} : vector<1x16xf32> to vector<1x4xf32>
    %98 = vector.extract_strided_slice %93 {offsets = [0, 12], sizes = [1, 4], strides = [1, 1]} : vector<1x16xf32> to vector<1x4xf32>
    %99 = arith.mulf %96, %65 : vector<1x4xf32>
    %100 = arith.mulf %95, %97 : vector<1x4xf32>
    %101 = arith.addf %99, %100 : vector<1x4xf32>
    %102 = math.tanh %101 : vector<1x4xf32>
    %103 = arith.mulf %98, %102 : vector<1x4xf32>
    %104 = vector.extract_strided_slice %7 {offsets = [5, 0], sizes = [1, 16], strides = [1, 1]} : vector<8x16xf32> to vector<1x16xf32>
    %cst_26 = arith.constant dense<0.000000e+00> : vector<1x16xf32>
    %105 = tpu.matmul %85, %9, %cst_26 {dimension_numbers = #tpu.dot_dimension_numbers<[1], [0], [0], [1], [0, 0, 1, 1], [], []>} : vector<1x4xf32>, vector<4x16xf32>, vector<1x16xf32> -> vector<1x16xf32>
    %106 = arith.addf %104, %105 : vector<1x16xf32>
    %107 = arith.negf %106 : vector<1x16xf32>
    %108 = math.exp %107 : vector<1x16xf32>
    %cst_27 = arith.constant 1.000000e+00 : f32
    %109 = vector.broadcast %cst_27 : f32 to vector<1x16xf32>
    %110 = arith.addf %109, %108 : vector<1x16xf32>
    %111 = arith.divf %109, %110 : vector<1x16xf32>
    %112 = math.tanh %106 : vector<1x16xf32>
    %113 = vector.extract_strided_slice %111 {offsets = [0, 0], sizes = [1, 4], strides = [1, 1]} : vector<1x16xf32> to vector<1x4xf32>
    %114 = vector.extract_strided_slice %111 {offsets = [0, 4], sizes = [1, 4], strides = [1, 1]} : vector<1x16xf32> to vector<1x4xf32>
    %115 = vector.extract_strided_slice %112 {offsets = [0, 8], sizes = [1, 4], strides = [1, 1]} : vector<1x16xf32> to vector<1x4xf32>
    %116 = vector.extract_strided_slice %111 {offsets = [0, 12], sizes = [1, 4], strides = [1, 1]} : vector<1x16xf32> to vector<1x4xf32>
    %117 = arith.mulf %114, %83 : vector<1x4xf32>
    %118 = arith.mulf %113, %115 : vector<1x4xf32>
    %119 = arith.addf %117, %118 : vector<1x4xf32>
    %120 = math.tanh %119 : vector<1x4xf32>
    %121 = arith.mulf %116, %120 : vector<1x4xf32>
    %122 = vector.extract_strided_slice %6 {offsets = [3, 0], sizes = [1, 16], strides = [1, 1]} : vector<8x16xf32> to vector<1x16xf32>
    %cst_28 = arith.constant dense<0.000000e+00> : vector<1x16xf32>
    %123 = tpu.matmul %103, %8, %cst_28 {dimension_numbers = #tpu.dot_dimension_numbers<[1], [0], [0], [1], [0, 0, 1, 1], [], []>} : vector<1x4xf32>, vector<4x16xf32>, vector<1x16xf32> -> vector<1x16xf32>
    %124 = arith.addf %122, %123 : vector<1x16xf32>
    %125 = arith.negf %124 : vector<1x16xf32>
    %126 = math.exp %125 : vector<1x16xf32>
    %cst_29 = arith.constant 1.000000e+00 : f32
    %127 = vector.broadcast %cst_29 : f32 to vector<1x16xf32>
    %128 = arith.addf %127, %126 : vector<1x16xf32>
    %129 = arith.divf %127, %128 : vector<1x16xf32>
    %130 = math.tanh %124 : vector<1x16xf32>
    %131 = vector.extract_strided_slice %129 {offsets = [0, 0], sizes = [1, 4], strides = [1, 1]} : vector<1x16xf32> to vector<1x4xf32>
    %132 = vector.extract_strided_slice %129 {offsets = [0, 4], sizes = [1, 4], strides = [1, 1]} : vector<1x16xf32> to vector<1x4xf32>
    %133 = vector.extract_strided_slice %130 {offsets = [0, 8], sizes = [1, 4], strides = [1, 1]} : vector<1x16xf32> to vector<1x4xf32>
    %134 = vector.extract_strided_slice %129 {offsets = [0, 12], sizes = [1, 4], strides = [1, 1]} : vector<1x16xf32> to vector<1x4xf32>
    %135 = arith.mulf %132, %101 : vector<1x4xf32>
    %136 = arith.mulf %131, %133 : vector<1x4xf32>
    %137 = arith.addf %135, %136 : vector<1x4xf32>
    %138 = math.tanh %137 : vector<1x4xf32>
    %139 = arith.mulf %134, %138 : vector<1x4xf32>
    %140 = vector.extract_strided_slice %7 {offsets = [4, 0], sizes = [1, 16], strides = [1, 1]} : vector<8x16xf32> to vector<1x16xf32>
    %cst_30 = arith.constant dense<0.000000e+00> : vector<1x16xf32>
    %141 = tpu.matmul %121, %9, %cst_30 {dimension_numbers = #tpu.dot_dimension_numbers<[1], [0], [0], [1], [0, 0, 1, 1], [], []>} : vector<1x4xf32>, vector<4x16xf32>, vector<1x16xf32> -> vector<1x16xf32>
    %142 = arith.addf %140, %141 : vector<1x16xf32>
    %143 = arith.negf %142 : vector<1x16xf32>
    %144 = math.exp %143 : vector<1x16xf32>
    %cst_31 = arith.constant 1.000000e+00 : f32
    %145 = vector.broadcast %cst_31 : f32 to vector<1x16xf32>
    %146 = arith.addf %145, %144 : vector<1x16xf32>
    %147 = arith.divf %145, %146 : vector<1x16xf32>
    %148 = math.tanh %142 : vector<1x16xf32>
    %149 = vector.extract_strided_slice %147 {offsets = [0, 0], sizes = [1, 4], strides = [1, 1]} : vector<1x16xf32> to vector<1x4xf32>
    %150 = vector.extract_strided_slice %147 {offsets = [0, 4], sizes = [1, 4], strides = [1, 1]} : vector<1x16xf32> to vector<1x4xf32>
    %151 = vector.extract_strided_slice %148 {offsets = [0, 8], sizes = [1, 4], strides = [1, 1]} : vector<1x16xf32> to vector<1x4xf32>
    %152 = vector.extract_strided_slice %147 {offsets = [0, 12], sizes = [1, 4], strides = [1, 1]} : vector<1x16xf32> to vector<1x4xf32>
    %153 = arith.mulf %150, %119 : vector<1x4xf32>
    %154 = arith.mulf %149, %151 : vector<1x4xf32>
    %155 = arith.addf %153, %154 : vector<1x4xf32>
    %156 = math.tanh %155 : vector<1x4xf32>
    %157 = arith.mulf %152, %156 : vector<1x4xf32>
    %158 = vector.extract_strided_slice %6 {offsets = [4, 0], sizes = [1, 16], strides = [1, 1]} : vector<8x16xf32> to vector<1x16xf32>
    %cst_32 = arith.constant dense<0.000000e+00> : vector<1x16xf32>
    %159 = tpu.matmul %139, %8, %cst_32 {dimension_numbers = #tpu.dot_dimension_numbers<[1], [0], [0], [1], [0, 0, 1, 1], [], []>} : vector<1x4xf32>, vector<4x16xf32>, vector<1x16xf32> -> vector<1x16xf32>
    %160 = arith.addf %158, %159 : vector<1x16xf32>
    %161 = arith.negf %160 : vector<1x16xf32>
    %162 = math.exp %161 : vector<1x16xf32>
    %cst_33 = arith.constant 1.000000e+00 : f32
    %163 = vector.broadcast %cst_33 : f32 to vector<1x16xf32>
    %164 = arith.addf %163, %162 : vector<1x16xf32>
    %165 = arith.divf %163, %164 : vector<1x16xf32>
    %166 = math.tanh %160 : vector<1x16xf32>
    %167 = vector.extract_strided_slice %165 {offsets = [0, 0], sizes = [1, 4], strides = [1, 1]} : vector<1x16xf32> to vector<1x4xf32>
    %168 = vector.extract_strided_slice %165 {offsets = [0, 4], sizes = [1, 4], strides = [1, 1]} : vector<1x16xf32> to vector<1x4xf32>
    %169 = vector.extract_strided_slice %166 {offsets = [0, 8], sizes = [1, 4], strides = [1, 1]} : vector<1x16xf32> to vector<1x4xf32>
    %170 = vector.extract_strided_slice %165 {offsets = [0, 12], sizes = [1, 4], strides = [1, 1]} : vector<1x16xf32> to vector<1x4xf32>
    %171 = arith.mulf %168, %137 : vector<1x4xf32>
    %172 = arith.mulf %167, %169 : vector<1x4xf32>
    %173 = arith.addf %171, %172 : vector<1x4xf32>
    %174 = math.tanh %173 : vector<1x4xf32>
    %175 = arith.mulf %170, %174 : vector<1x4xf32>
    %176 = vector.extract_strided_slice %7 {offsets = [3, 0], sizes = [1, 16], strides = [1, 1]} : vector<8x16xf32> to vector<1x16xf32>
    %cst_34 = arith.constant dense<0.000000e+00> : vector<1x16xf32>
    %177 = tpu.matmul %157, %9, %cst_34 {dimension_numbers = #tpu.dot_dimension_numbers<[1], [0], [0], [1], [0, 0, 1, 1], [], []>} : vector<1x4xf32>, vector<4x16xf32>, vector<1x16xf32> -> vector<1x16xf32>
    %178 = arith.addf %176, %177 : vector<1x16xf32>
    %179 = arith.negf %178 : vector<1x16xf32>
    %180 = math.exp %179 : vector<1x16xf32>
    %cst_35 = arith.constant 1.000000e+00 : f32
    %181 = vector.broadcast %cst_35 : f32 to vector<1x16xf32>
    %182 = arith.addf %181, %180 : vector<1x16xf32>
    %183 = arith.divf %181, %182 : vector<1x16xf32>
    %184 = math.tanh %178 : vector<1x16xf32>
    %185 = vector.extract_strided_slice %183 {offsets = [0, 0], sizes = [1, 4], strides = [1, 1]} : vector<1x16xf32> to vector<1x4xf32>
    %186 = vector.extract_strided_slice %183 {offsets = [0, 4], sizes = [1, 4], strides = [1, 1]} : vector<1x16xf32> to vector<1x4xf32>
    %187 = vector.extract_strided_slice %184 {offsets = [0, 8], sizes = [1, 4], strides = [1, 1]} : vector<1x16xf32> to vector<1x4xf32>
    %188 = vector.extract_strided_slice %183 {offsets = [0, 12], sizes = [1, 4], strides = [1, 1]} : vector<1x16xf32> to vector<1x4xf32>
    %189 = arith.mulf %186, %155 : vector<1x4xf32>
    %190 = arith.mulf %185, %187 : vector<1x4xf32>
    %191 = arith.addf %189, %190 : vector<1x4xf32>
    %192 = math.tanh %191 : vector<1x4xf32>
    %193 = arith.mulf %188, %192 : vector<1x4xf32>
    %194 = vector.extract_strided_slice %6 {offsets = [5, 0], sizes = [1, 16], strides = [1, 1]} : vector<8x16xf32> to vector<1x16xf32>
    %cst_36 = arith.constant dense<0.000000e+00> : vector<1x16xf32>
    %195 = tpu.matmul %175, %8, %cst_36 {dimension_numbers = #tpu.dot_dimension_numbers<[1], [0], [0], [1], [0, 0, 1, 1], [], []>} : vector<1x4xf32>, vector<4x16xf32>, vector<1x16xf32> -> vector<1x16xf32>
    %196 = arith.addf %194, %195 : vector<1x16xf32>
    %197 = arith.negf %196 : vector<1x16xf32>
    %198 = math.exp %197 : vector<1x16xf32>
    %cst_37 = arith.constant 1.000000e+00 : f32
    %199 = vector.broadcast %cst_37 : f32 to vector<1x16xf32>
    %200 = arith.addf %199, %198 : vector<1x16xf32>
    %201 = arith.divf %199, %200 : vector<1x16xf32>
    %202 = math.tanh %196 : vector<1x16xf32>
    %203 = vector.extract_strided_slice %201 {offsets = [0, 0], sizes = [1, 4], strides = [1, 1]} : vector<1x16xf32> to vector<1x4xf32>
    %204 = vector.extract_strided_slice %201 {offsets = [0, 4], sizes = [1, 4], strides = [1, 1]} : vector<1x16xf32> to vector<1x4xf32>
    %205 = vector.extract_strided_slice %202 {offsets = [0, 8], sizes = [1, 4], strides = [1, 1]} : vector<1x16xf32> to vector<1x4xf32>
    %206 = vector.extract_strided_slice %201 {offsets = [0, 12], sizes = [1, 4], strides = [1, 1]} : vector<1x16xf32> to vector<1x4xf32>
    %207 = arith.mulf %204, %173 : vector<1x4xf32>
    %208 = arith.mulf %203, %205 : vector<1x4xf32>
    %209 = arith.addf %207, %208 : vector<1x4xf32>
    %210 = math.tanh %209 : vector<1x4xf32>
    %211 = arith.mulf %206, %210 : vector<1x4xf32>
    %212 = vector.extract_strided_slice %7 {offsets = [2, 0], sizes = [1, 16], strides = [1, 1]} : vector<8x16xf32> to vector<1x16xf32>
    %cst_38 = arith.constant dense<0.000000e+00> : vector<1x16xf32>
    %213 = tpu.matmul %193, %9, %cst_38 {dimension_numbers = #tpu.dot_dimension_numbers<[1], [0], [0], [1], [0, 0, 1, 1], [], []>} : vector<1x4xf32>, vector<4x16xf32>, vector<1x16xf32> -> vector<1x16xf32>
    %214 = arith.addf %212, %213 : vector<1x16xf32>
    %215 = arith.negf %214 : vector<1x16xf32>
    %216 = math.exp %215 : vector<1x16xf32>
    %cst_39 = arith.constant 1.000000e+00 : f32
    %217 = vector.broadcast %cst_39 : f32 to vector<1x16xf32>
    %218 = arith.addf %217, %216 : vector<1x16xf32>
    %219 = arith.divf %217, %218 : vector<1x16xf32>
    %220 = math.tanh %214 : vector<1x16xf32>
    %221 = vector.extract_strided_slice %219 {offsets = [0, 0], sizes = [1, 4], strides = [1, 1]} : vector<1x16xf32> to vector<1x4xf32>
    %222 = vector.extract_strided_slice %219 {offsets = [0, 4], sizes = [1, 4], strides = [1, 1]} : vector<1x16xf32> to vector<1x4xf32>
    %223 = vector.extract_strided_slice %220 {offsets = [0, 8], sizes = [1, 4], strides = [1, 1]} : vector<1x16xf32> to vector<1x4xf32>
    %224 = vector.extract_strided_slice %219 {offsets = [0, 12], sizes = [1, 4], strides = [1, 1]} : vector<1x16xf32> to vector<1x4xf32>
    %225 = arith.mulf %222, %191 : vector<1x4xf32>
    %226 = arith.mulf %221, %223 : vector<1x4xf32>
    %227 = arith.addf %225, %226 : vector<1x4xf32>
    %228 = math.tanh %227 : vector<1x4xf32>
    %229 = arith.mulf %224, %228 : vector<1x4xf32>
    %230 = vector.extract_strided_slice %6 {offsets = [6, 0], sizes = [1, 16], strides = [1, 1]} : vector<8x16xf32> to vector<1x16xf32>
    %cst_40 = arith.constant dense<0.000000e+00> : vector<1x16xf32>
    %231 = tpu.matmul %211, %8, %cst_40 {dimension_numbers = #tpu.dot_dimension_numbers<[1], [0], [0], [1], [0, 0, 1, 1], [], []>} : vector<1x4xf32>, vector<4x16xf32>, vector<1x16xf32> -> vector<1x16xf32>
    %232 = arith.addf %230, %231 : vector<1x16xf32>
    %233 = arith.negf %232 : vector<1x16xf32>
    %234 = math.exp %233 : vector<1x16xf32>
    %cst_41 = arith.constant 1.000000e+00 : f32
    %235 = vector.broadcast %cst_41 : f32 to vector<1x16xf32>
    %236 = arith.addf %235, %234 : vector<1x16xf32>
    %237 = arith.divf %235, %236 : vector<1x16xf32>
    %238 = math.tanh %232 : vector<1x16xf32>
    %239 = vector.extract_strided_slice %237 {offsets = [0, 0], sizes = [1, 4], strides = [1, 1]} : vector<1x16xf32> to vector<1x4xf32>
    %240 = vector.extract_strided_slice %237 {offsets = [0, 4], sizes = [1, 4], strides = [1, 1]} : vector<1x16xf32> to vector<1x4xf32>
    %241 = vector.extract_strided_slice %238 {offsets = [0, 8], sizes = [1, 4], strides = [1, 1]} : vector<1x16xf32> to vector<1x4xf32>
    %242 = vector.extract_strided_slice %237 {offsets = [0, 12], sizes = [1, 4], strides = [1, 1]} : vector<1x16xf32> to vector<1x4xf32>
    %243 = arith.mulf %240, %209 : vector<1x4xf32>
    %244 = arith.mulf %239, %241 : vector<1x4xf32>
    %245 = arith.addf %243, %244 : vector<1x4xf32>
    %246 = math.tanh %245 : vector<1x4xf32>
    %247 = arith.mulf %242, %246 : vector<1x4xf32>
    %248 = vector.extract_strided_slice %7 {offsets = [1, 0], sizes = [1, 16], strides = [1, 1]} : vector<8x16xf32> to vector<1x16xf32>
    %cst_42 = arith.constant dense<0.000000e+00> : vector<1x16xf32>
    %249 = tpu.matmul %229, %9, %cst_42 {dimension_numbers = #tpu.dot_dimension_numbers<[1], [0], [0], [1], [0, 0, 1, 1], [], []>} : vector<1x4xf32>, vector<4x16xf32>, vector<1x16xf32> -> vector<1x16xf32>
    %250 = arith.addf %248, %249 : vector<1x16xf32>
    %251 = arith.negf %250 : vector<1x16xf32>
    %252 = math.exp %251 : vector<1x16xf32>
    %cst_43 = arith.constant 1.000000e+00 : f32
    %253 = vector.broadcast %cst_43 : f32 to vector<1x16xf32>
    %254 = arith.addf %253, %252 : vector<1x16xf32>
    %255 = arith.divf %253, %254 : vector<1x16xf32>
    %256 = math.tanh %250 : vector<1x16xf32>
    %257 = vector.extract_strided_slice %255 {offsets = [0, 0], sizes = [1, 4], strides = [1, 1]} : vector<1x16xf32> to vector<1x4xf32>
    %258 = vector.extract_strided_slice %255 {offsets = [0, 4], sizes = [1, 4], strides = [1, 1]} : vector<1x16xf32> to vector<1x4xf32>
    %259 = vector.extract_strided_slice %256 {offsets = [0, 8], sizes = [1, 4], strides = [1, 1]} : vector<1x16xf32> to vector<1x4xf32>
    %260 = vector.extract_strided_slice %255 {offsets = [0, 12], sizes = [1, 4], strides = [1, 1]} : vector<1x16xf32> to vector<1x4xf32>
    %261 = arith.mulf %258, %227 : vector<1x4xf32>
    %262 = arith.mulf %257, %259 : vector<1x4xf32>
    %263 = arith.addf %261, %262 : vector<1x4xf32>
    %264 = math.tanh %263 : vector<1x4xf32>
    %265 = arith.mulf %260, %264 : vector<1x4xf32>
    %266 = vector.extract_strided_slice %6 {offsets = [7, 0], sizes = [1, 16], strides = [1, 1]} : vector<8x16xf32> to vector<1x16xf32>
    %cst_44 = arith.constant dense<0.000000e+00> : vector<1x16xf32>
    %267 = tpu.matmul %247, %8, %cst_44 {dimension_numbers = #tpu.dot_dimension_numbers<[1], [0], [0], [1], [0, 0, 1, 1], [], []>} : vector<1x4xf32>, vector<4x16xf32>, vector<1x16xf32> -> vector<1x16xf32>
    %268 = arith.addf %266, %267 : vector<1x16xf32>
    %269 = arith.negf %268 : vector<1x16xf32>
    %270 = math.exp %269 : vector<1x16xf32>
    %cst_45 = arith.constant 1.000000e+00 : f32
    %271 = vector.broadcast %cst_45 : f32 to vector<1x16xf32>
    %272 = arith.addf %271, %270 : vector<1x16xf32>
    %273 = arith.divf %271, %272 : vector<1x16xf32>
    %274 = math.tanh %268 : vector<1x16xf32>
    %275 = vector.extract_strided_slice %273 {offsets = [0, 0], sizes = [1, 4], strides = [1, 1]} : vector<1x16xf32> to vector<1x4xf32>
    %276 = vector.extract_strided_slice %273 {offsets = [0, 4], sizes = [1, 4], strides = [1, 1]} : vector<1x16xf32> to vector<1x4xf32>
    %277 = vector.extract_strided_slice %274 {offsets = [0, 8], sizes = [1, 4], strides = [1, 1]} : vector<1x16xf32> to vector<1x4xf32>
    %278 = vector.extract_strided_slice %273 {offsets = [0, 12], sizes = [1, 4], strides = [1, 1]} : vector<1x16xf32> to vector<1x4xf32>
    %279 = arith.mulf %276, %245 : vector<1x4xf32>
    %280 = arith.mulf %275, %277 : vector<1x4xf32>
    %281 = arith.addf %279, %280 : vector<1x4xf32>
    %282 = math.tanh %281 : vector<1x4xf32>
    %283 = arith.mulf %278, %282 : vector<1x4xf32>
    %284 = vector.extract_strided_slice %7 {offsets = [0, 0], sizes = [1, 16], strides = [1, 1]} : vector<8x16xf32> to vector<1x16xf32>
    %cst_46 = arith.constant dense<0.000000e+00> : vector<1x16xf32>
    %285 = tpu.matmul %265, %9, %cst_46 {dimension_numbers = #tpu.dot_dimension_numbers<[1], [0], [0], [1], [0, 0, 1, 1], [], []>} : vector<1x4xf32>, vector<4x16xf32>, vector<1x16xf32> -> vector<1x16xf32>
    %286 = arith.addf %284, %285 : vector<1x16xf32>
    %287 = arith.negf %286 : vector<1x16xf32>
    %288 = math.exp %287 : vector<1x16xf32>
    %cst_47 = arith.constant 1.000000e+00 : f32
    %289 = vector.broadcast %cst_47 : f32 to vector<1x16xf32>
    %290 = arith.addf %289, %288 : vector<1x16xf32>
    %291 = arith.divf %289, %290 : vector<1x16xf32>
    %292 = math.tanh %286 : vector<1x16xf32>
    %293 = vector.extract_strided_slice %291 {offsets = [0, 0], sizes = [1, 4], strides = [1, 1]} : vector<1x16xf32> to vector<1x4xf32>
    %294 = vector.extract_strided_slice %291 {offsets = [0, 4], sizes = [1, 4], strides = [1, 1]} : vector<1x16xf32> to vector<1x4xf32>
    %295 = vector.extract_strided_slice %292 {offsets = [0, 8], sizes = [1, 4], strides = [1, 1]} : vector<1x16xf32> to vector<1x4xf32>
    %296 = vector.extract_strided_slice %291 {offsets = [0, 12], sizes = [1, 4], strides = [1, 1]} : vector<1x16xf32> to vector<1x4xf32>
    %297 = arith.mulf %294, %263 : vector<1x4xf32>
    %298 = arith.mulf %293, %295 : vector<1x4xf32>
    %299 = arith.addf %297, %298 : vector<1x4xf32>
    %300 = math.tanh %299 : vector<1x4xf32>
    %301 = arith.mulf %296, %300 : vector<1x4xf32>
    %302 = tpu.concatenate %31, %67, %103, %139, %175, %211, %247, %283 in 0 : vector<1x4xf32>, vector<1x4xf32>, vector<1x4xf32>, vector<1x4xf32>, vector<1x4xf32>, vector<1x4xf32>, vector<1x4xf32>, vector<1x4xf32> -> vector<8x4xf32>
    %303 = tpu.concatenate %301, %265, %229, %193, %157, %121, %85, %49 in 0 : vector<1x4xf32>, vector<1x4xf32>, vector<1x4xf32>, vector<1x4xf32>, vector<1x4xf32>, vector<1x4xf32>, vector<1x4xf32>, vector<1x4xf32> -> vector<8x4xf32>
    %c0_48 = arith.constant 0 : index
    %c0_49 = arith.constant 0 : index
    %304 = vector.load %arg7[%c0_48, %c0_49] : memref<8x5xf32, #tpu.memory_space<vmem>>, vector<4x5xf32>
    %cst_50 = arith.constant dense<0.000000e+00> : vector<8x5xf32>
    %305 = tpu.matmul %302, %304, %cst_50 {dimension_numbers = #tpu.dot_dimension_numbers<[1], [0], [0], [1], [0, 0, 1, 1], [], []>} : vector<8x4xf32>, vector<4x5xf32>, vector<8x5xf32> -> vector<8x5xf32>
    %c4 = arith.constant 4 : index
    %c0_51 = arith.constant 0 : index
    %306 = vector.load %arg7[%c4, %c0_51] : memref<8x5xf32, #tpu.memory_space<vmem>>, vector<4x5xf32>
    %cst_52 = arith.constant dense<0.000000e+00> : vector<8x5xf32>
    %307 = tpu.matmul %303, %306, %cst_52 {dimension_numbers = #tpu.dot_dimension_numbers<[1], [0], [0], [1], [0, 0, 1, 1], [], []>} : vector<8x4xf32>, vector<4x5xf32>, vector<8x5xf32> -> vector<8x5xf32>
    %308 = arith.addf %305, %307 : vector<8x5xf32>
    %c0_53 = arith.constant 0 : index
    %c0_54 = arith.constant 0 : index
    %309 = vector.load %arg8[%c0_53, %c0_54] : memref<1x5xf32, #tpu.memory_space<vmem>>, vector<1x5xf32>
    %310 = vector.broadcast %309 : vector<1x5xf32> to vector<8x5xf32>
    %311 = arith.addf %308, %310 : vector<8x5xf32>
    %c0_55 = arith.constant 0 : index
    %c0_56 = arith.constant 0 : index
    %312 = vector.load %arg10[%c0_55, %c0_56] : memref<8x5xf32, #tpu.memory_space<vmem>>, vector<8x5xf32>
    tpu.vector_store %arg10[%c0_55, %c0_56], %311 {strides = array<i32>} : memref<8x5xf32, #tpu.memory_space<vmem>>, vector<8x5xf32>,
    %313 = tpu.iota {dimensions = array<i32: 1>} : vector<1x5xi32>
    %314 = tpu.iota {dimensions = array<i32: 1>} : vector<5x5xi32>
    %315 = tpu.iota {dimensions = array<i32: 1>} : vector<1x8xi32>
    %c0_57 = arith.constant 0 : index
    %c0_58 = arith.constant 0 : index
    %316 = vector.load %arg9[%c0_57, %c0_58] : memref<5x5xf32, #tpu.memory_space<vmem>>, vector<5x5xf32>
    %c3_i32 = arith.constant 3 : i32
    %317 = vector.broadcast %c3_i32 : i32 to vector<1x5xi32>
    %318 = arith.cmpi eq, %313, %317 : vector<1x5xi32>
    %cst_59 = arith.constant 0.000000e+00 : f32
    %cst_60 = arith.constant -1.000000e+04 : f32
    %319 = vector.broadcast %cst_59 : f32 to vector<1x5xf32>
    %320 = vector.broadcast %cst_60 : f32 to vector<1x5xf32>
    %321 = arith.select %318, %319, %320 : vector<1x5xi1>, vector<1x5xf32>
    %322 = vector.broadcast %321 : vector<1x5xf32> to vector<5x5xf32>
    %323 = arith.addf %316, %322 : vector<5x5xf32>
    %cst_61 = arith.constant dense<0xFF800000> : vector<5xf32>
    %324 = vector.multi_reduction <maximumf>, %323, %cst_61 [1] : vector<5x5xf32> to vector<5xf32>
    %325 = vector.shape_cast %324 : vector<5xf32> to vector<5x1xf32>
    %326 = vector.shape_cast %325 : vector<5x1xf32> to vector<1x5xf32>
    %327 = vector.extract_strided_slice %311 {offsets = [0, 0], sizes = [1, 5], strides = [1, 1]} : vector<8x5xf32> to vector<1x5xf32>
    %328 = arith.addf %326, %327 : vector<1x5xf32>
    %329 = vector.broadcast %328 : vector<1x5xf32> to vector<5x5xf32>
    %330 = arith.addf %316, %329 : vector<5x5xf32>
    %cst_62 = arith.constant dense<0xFF800000> : vector<5xf32>
    %331 = vector.multi_reduction <maximumf>, %330, %cst_62 [1] : vector<5x5xf32> to vector<5xf32>
    %332 = vector.shape_cast %331 : vector<5xf32> to vector<5x1xf32>
    %333 = vector.broadcast %332 : vector<5x1xf32> to vector<5x5xf32>
    %334 = arith.cmpf oeq, %330, %333 : vector<5x5xf32>
    %c5_i32 = arith.constant 5 : i32
    %335 = vector.broadcast %c5_i32 : i32 to vector<5x5xi32>
    %336 = arith.select %334, %314, %335 : vector<5x5xi1>, vector<5x5xi32>
    %cst_63 = arith.constant dense<2147483647> : vector<5xi32>
    %337 = vector.multi_reduction <minsi>, %336, %cst_63 [1] : vector<5x5xi32> to vector<5xi32>
    %338 = vector.shape_cast %337 : vector<5xi32> to vector<5x1xi32>
    %339 = vector.shape_cast %338 : vector<5x1xi32> to vector<1x5xi32>
    %340 = vector.shape_cast %332 : vector<5x1xf32> to vector<1x5xf32>
    %341 = vector.extract_strided_slice %311 {offsets = [1, 0], sizes = [1, 5], strides = [1, 1]} : vector<8x5xf32> to vector<1x5xf32>
    %342 = arith.addf %340, %341 : vector<1x5xf32>
    %343 = vector.broadcast %342 : vector<1x5xf32> to vector<5x5xf32>
    %344 = arith.addf %316, %343 : vector<5x5xf32>
    %cst_64 = arith.constant dense<0xFF800000> : vector<5xf32>
    %345 = vector.multi_reduction <maximumf>, %344, %cst_64 [1] : vector<5x5xf32> to vector<5xf32>
    %346 = vector.shape_cast %345 : vector<5xf32> to vector<5x1xf32>
    %347 = vector.broadcast %346 : vector<5x1xf32> to vector<5x5xf32>
    %348 = arith.cmpf oeq, %344, %347 : vector<5x5xf32>
    %c5_i32_65 = arith.constant 5 : i32
    %349 = vector.broadcast %c5_i32_65 : i32 to vector<5x5xi32>
    %350 = arith.select %348, %314, %349 : vector<5x5xi1>, vector<5x5xi32>
    %cst_66 = arith.constant dense<2147483647> : vector<5xi32>
    %351 = vector.multi_reduction <minsi>, %350, %cst_66 [1] : vector<5x5xi32> to vector<5xi32>
    %352 = vector.shape_cast %351 : vector<5xi32> to vector<5x1xi32>
    %353 = vector.shape_cast %352 : vector<5x1xi32> to vector<1x5xi32>
    %354 = vector.shape_cast %346 : vector<5x1xf32> to vector<1x5xf32>
    %355 = vector.extract_strided_slice %311 {offsets = [2, 0], sizes = [1, 5], strides = [1, 1]} : vector<8x5xf32> to vector<1x5xf32>
    %356 = arith.addf %354, %355 : vector<1x5xf32>
    %357 = vector.broadcast %356 : vector<1x5xf32> to vector<5x5xf32>
    %358 = arith.addf %316, %357 : vector<5x5xf32>
    %cst_67 = arith.constant dense<0xFF800000> : vector<5xf32>
    %359 = vector.multi_reduction <maximumf>, %358, %cst_67 [1] : vector<5x5xf32> to vector<5xf32>
    %360 = vector.shape_cast %359 : vector<5xf32> to vector<5x1xf32>
    %361 = vector.broadcast %360 : vector<5x1xf32> to vector<5x5xf32>
    %362 = arith.cmpf oeq, %358, %361 : vector<5x5xf32>
    %c5_i32_68 = arith.constant 5 : i32
    %363 = vector.broadcast %c5_i32_68 : i32 to vector<5x5xi32>
    %364 = arith.select %362, %314, %363 : vector<5x5xi1>, vector<5x5xi32>
    %cst_69 = arith.constant dense<2147483647> : vector<5xi32>
    %365 = vector.multi_reduction <minsi>, %364, %cst_69 [1] : vector<5x5xi32> to vector<5xi32>
    %366 = vector.shape_cast %365 : vector<5xi32> to vector<5x1xi32>
    %367 = vector.shape_cast %366 : vector<5x1xi32> to vector<1x5xi32>
    %368 = vector.shape_cast %360 : vector<5x1xf32> to vector<1x5xf32>
    %369 = vector.extract_strided_slice %311 {offsets = [3, 0], sizes = [1, 5], strides = [1, 1]} : vector<8x5xf32> to vector<1x5xf32>
    %370 = arith.addf %368, %369 : vector<1x5xf32>
    %371 = vector.broadcast %370 : vector<1x5xf32> to vector<5x5xf32>
    %372 = arith.addf %316, %371 : vector<5x5xf32>
    %cst_70 = arith.constant dense<0xFF800000> : vector<5xf32>
    %373 = vector.multi_reduction <maximumf>, %372, %cst_70 [1] : vector<5x5xf32> to vector<5xf32>
    %374 = vector.shape_cast %373 : vector<5xf32> to vector<5x1xf32>
    %375 = vector.broadcast %374 : vector<5x1xf32> to vector<5x5xf32>
    %376 = arith.cmpf oeq, %372, %375 : vector<5x5xf32>
    %c5_i32_71 = arith.constant 5 : i32
    %377 = vector.broadcast %c5_i32_71 : i32 to vector<5x5xi32>
    %378 = arith.select %376, %314, %377 : vector<5x5xi1>, vector<5x5xi32>
    %cst_72 = arith.constant dense<2147483647> : vector<5xi32>
    %379 = vector.multi_reduction <minsi>, %378, %cst_72 [1] : vector<5x5xi32> to vector<5xi32>
    %380 = vector.shape_cast %379 : vector<5xi32> to vector<5x1xi32>
    %381 = vector.shape_cast %380 : vector<5x1xi32> to vector<1x5xi32>
    %382 = vector.shape_cast %374 : vector<5x1xf32> to vector<1x5xf32>
    %383 = vector.extract_strided_slice %311 {offsets = [4, 0], sizes = [1, 5], strides = [1, 1]} : vector<8x5xf32> to vector<1x5xf32>
    %384 = arith.addf %382, %383 : vector<1x5xf32>
    %385 = vector.broadcast %384 : vector<1x5xf32> to vector<5x5xf32>
    %386 = arith.addf %316, %385 : vector<5x5xf32>
    %cst_73 = arith.constant dense<0xFF800000> : vector<5xf32>
    %387 = vector.multi_reduction <maximumf>, %386, %cst_73 [1] : vector<5x5xf32> to vector<5xf32>
    %388 = vector.shape_cast %387 : vector<5xf32> to vector<5x1xf32>
    %389 = vector.broadcast %388 : vector<5x1xf32> to vector<5x5xf32>
    %390 = arith.cmpf oeq, %386, %389 : vector<5x5xf32>
    %c5_i32_74 = arith.constant 5 : i32
    %391 = vector.broadcast %c5_i32_74 : i32 to vector<5x5xi32>
    %392 = arith.select %390, %314, %391 : vector<5x5xi1>, vector<5x5xi32>
    %cst_75 = arith.constant dense<2147483647> : vector<5xi32>
    %393 = vector.multi_reduction <minsi>, %392, %cst_75 [1] : vector<5x5xi32> to vector<5xi32>
    %394 = vector.shape_cast %393 : vector<5xi32> to vector<5x1xi32>
    %395 = vector.shape_cast %394 : vector<5x1xi32> to vector<1x5xi32>
    %396 = vector.shape_cast %388 : vector<5x1xf32> to vector<1x5xf32>
    %397 = vector.extract_strided_slice %311 {offsets = [5, 0], sizes = [1, 5], strides = [1, 1]} : vector<8x5xf32> to vector<1x5xf32>
    %398 = arith.addf %396, %397 : vector<1x5xf32>
    %399 = vector.broadcast %398 : vector<1x5xf32> to vector<5x5xf32>
    %400 = arith.addf %316, %399 : vector<5x5xf32>
    %cst_76 = arith.constant dense<0xFF800000> : vector<5xf32>
    %401 = vector.multi_reduction <maximumf>, %400, %cst_76 [1] : vector<5x5xf32> to vector<5xf32>
    %402 = vector.shape_cast %401 : vector<5xf32> to vector<5x1xf32>
    %403 = vector.broadcast %402 : vector<5x1xf32> to vector<5x5xf32>
    %404 = arith.cmpf oeq, %400, %403 : vector<5x5xf32>
    %c5_i32_77 = arith.constant 5 : i32
    %405 = vector.broadcast %c5_i32_77 : i32 to vector<5x5xi32>
    %406 = arith.select %404, %314, %405 : vector<5x5xi1>, vector<5x5xi32>
    %cst_78 = arith.constant dense<2147483647> : vector<5xi32>
    %407 = vector.multi_reduction <minsi>, %406, %cst_78 [1] : vector<5x5xi32> to vector<5xi32>
    %408 = vector.shape_cast %407 : vector<5xi32> to vector<5x1xi32>
    %409 = vector.shape_cast %408 : vector<5x1xi32> to vector<1x5xi32>
    %410 = vector.shape_cast %402 : vector<5x1xf32> to vector<1x5xf32>
    %411 = vector.extract_strided_slice %311 {offsets = [6, 0], sizes = [1, 5], strides = [1, 1]} : vector<8x5xf32> to vector<1x5xf32>
    %412 = arith.addf %410, %411 : vector<1x5xf32>
    %413 = vector.broadcast %412 : vector<1x5xf32> to vector<5x5xf32>
    %414 = arith.addf %316, %413 : vector<5x5xf32>
    %cst_79 = arith.constant dense<0xFF800000> : vector<5xf32>
    %415 = vector.multi_reduction <maximumf>, %414, %cst_79 [1] : vector<5x5xf32> to vector<5xf32>
    %416 = vector.shape_cast %415 : vector<5xf32> to vector<5x1xf32>
    %417 = vector.broadcast %416 : vector<5x1xf32> to vector<5x5xf32>
    %418 = arith.cmpf oeq, %414, %417 : vector<5x5xf32>
    %c5_i32_80 = arith.constant 5 : i32
    %419 = vector.broadcast %c5_i32_80 : i32 to vector<5x5xi32>
    %420 = arith.select %418, %314, %419 : vector<5x5xi1>, vector<5x5xi32>
    %cst_81 = arith.constant dense<2147483647> : vector<5xi32>
    %421 = vector.multi_reduction <minsi>, %420, %cst_81 [1] : vector<5x5xi32> to vector<5xi32>
    %422 = vector.shape_cast %421 : vector<5xi32> to vector<5x1xi32>
    %423 = vector.shape_cast %422 : vector<5x1xi32> to vector<1x5xi32>
    %424 = vector.shape_cast %416 : vector<5x1xf32> to vector<1x5xf32>
    %425 = vector.extract_strided_slice %311 {offsets = [7, 0], sizes = [1, 5], strides = [1, 1]} : vector<8x5xf32> to vector<1x5xf32>
    %426 = arith.addf %424, %425 : vector<1x5xf32>
    %427 = vector.extract_strided_slice %316 {offsets = [4, 0], sizes = [1, 5], strides = [1, 1]} : vector<5x5xf32> to vector<1x5xf32>
    %428 = arith.addf %426, %427 : vector<1x5xf32>
    %cst_82 = arith.constant dense<0xFF800000> : vector<1xf32>
    %429 = vector.multi_reduction <maximumf>, %428, %cst_82 [1] : vector<1x5xf32> to vector<1xf32>
    %430 = vector.shape_cast %429 : vector<1xf32> to vector<1x1xf32>
    %431 = vector.broadcast %430 : vector<1x1xf32> to vector<1x5xf32>
    %432 = arith.cmpf oeq, %428, %431 : vector<1x5xf32>
    %c5_i32_83 = arith.constant 5 : i32
    %433 = vector.broadcast %c5_i32_83 : i32 to vector<1x5xi32>
    %434 = arith.select %432, %313, %433 : vector<1x5xi1>, vector<1x5xi32>
    %cst_84 = arith.constant dense<2147483647> : vector<1xi32>
    %435 = vector.multi_reduction <minsi>, %434, %cst_84 [1] : vector<1x5xi32> to vector<1xi32>
    %436 = vector.shape_cast %435 : vector<1xi32> to vector<1x1xi32>
    %c0_85 = arith.constant 0 : index
    %c0_86 = arith.constant 0 : index
    %437 = vector.load %arg11[%c0_85, %c0_86] : memref<1x1xf32, #tpu.memory_space<vmem>>, vector<1x1xf32>
    tpu.vector_store %arg11[%c0_85, %c0_86], %430 {strides = array<i32>} : memref<1x1xf32, #tpu.memory_space<vmem>>, vector<1x1xf32>,
    %c7_i32 = arith.constant 7 : i32
    %438 = vector.broadcast %c7_i32 : i32 to vector<1x8xi32>
    %439 = arith.cmpi eq, %315, %438 : vector<1x8xi32>
    %c0_i32 = arith.constant 0 : i32
    %440 = vector.broadcast %c0_i32 : i32 to vector<1x8xi32>
    %441 = vector.shape_cast %436 : vector<1x1xi32> to vector<1x1xi32>
    %442 = vector.broadcast %441 : vector<1x1xi32> to vector<1x8xi32>
    %443 = arith.select %439, %442, %440 : vector<1x8xi1>, vector<1x8xi32>
    %444 = vector.broadcast %436 : vector<1x1xi32> to vector<1x5xi32>
    %445 = arith.cmpi eq, %313, %444 : vector<1x5xi32>
    %c0_i32_87 = arith.constant 0 : i32
    %446 = vector.broadcast %c0_i32_87 : i32 to vector<1x5xi32>
    %447 = arith.select %445, %423, %446 : vector<1x5xi1>, vector<1x5xi32>
    %cst_88 = arith.constant dense<0> : vector<1xi32>
    %448 = vector.multi_reduction <add>, %447, %cst_88 [1] : vector<1x5xi32> to vector<1xi32>
    %449 = vector.shape_cast %448 : vector<1xi32> to vector<1x1xi32>
    %c6_i32 = arith.constant 6 : i32
    %450 = vector.broadcast %c6_i32 : i32 to vector<1x8xi32>
    %451 = arith.cmpi eq, %315, %450 : vector<1x8xi32>
    %452 = vector.shape_cast %449 : vector<1x1xi32> to vector<1x1xi32>
    %453 = vector.broadcast %452 : vector<1x1xi32> to vector<1x8xi32>
    %454 = arith.select %451, %453, %443 : vector<1x8xi1>, vector<1x8xi32>
    %455 = vector.broadcast %449 : vector<1x1xi32> to vector<1x5xi32>
    %456 = arith.cmpi eq, %313, %455 : vector<1x5xi32>
    %c0_i32_89 = arith.constant 0 : i32
    %457 = vector.broadcast %c0_i32_89 : i32 to vector<1x5xi32>
    %458 = arith.select %456, %409, %457 : vector<1x5xi1>, vector<1x5xi32>
    %cst_90 = arith.constant dense<0> : vector<1xi32>
    %459 = vector.multi_reduction <add>, %458, %cst_90 [1] : vector<1x5xi32> to vector<1xi32>
    %460 = vector.shape_cast %459 : vector<1xi32> to vector<1x1xi32>
    %c5_i32_91 = arith.constant 5 : i32
    %461 = vector.broadcast %c5_i32_91 : i32 to vector<1x8xi32>
    %462 = arith.cmpi eq, %315, %461 : vector<1x8xi32>
    %463 = vector.shape_cast %460 : vector<1x1xi32> to vector<1x1xi32>
    %464 = vector.broadcast %463 : vector<1x1xi32> to vector<1x8xi32>
    %465 = arith.select %462, %464, %454 : vector<1x8xi1>, vector<1x8xi32>
    %466 = vector.broadcast %460 : vector<1x1xi32> to vector<1x5xi32>
    %467 = arith.cmpi eq, %313, %466 : vector<1x5xi32>
    %c0_i32_92 = arith.constant 0 : i32
    %468 = vector.broadcast %c0_i32_92 : i32 to vector<1x5xi32>
    %469 = arith.select %467, %395, %468 : vector<1x5xi1>, vector<1x5xi32>
    %cst_93 = arith.constant dense<0> : vector<1xi32>
    %470 = vector.multi_reduction <add>, %469, %cst_93 [1] : vector<1x5xi32> to vector<1xi32>
    %471 = vector.shape_cast %470 : vector<1xi32> to vector<1x1xi32>
    %c4_i32 = arith.constant 4 : i32
    %472 = vector.broadcast %c4_i32 : i32 to vector<1x8xi32>
    %473 = arith.cmpi eq, %315, %472 : vector<1x8xi32>
    %474 = vector.shape_cast %471 : vector<1x1xi32> to vector<1x1xi32>
    %475 = vector.broadcast %474 : vector<1x1xi32> to vector<1x8xi32>
    %476 = arith.select %473, %475, %465 : vector<1x8xi1>, vector<1x8xi32>
    %477 = vector.broadcast %471 : vector<1x1xi32> to vector<1x5xi32>
    %478 = arith.cmpi eq, %313, %477 : vector<1x5xi32>
    %c0_i32_94 = arith.constant 0 : i32
    %479 = vector.broadcast %c0_i32_94 : i32 to vector<1x5xi32>
    %480 = arith.select %478, %381, %479 : vector<1x5xi1>, vector<1x5xi32>
    %cst_95 = arith.constant dense<0> : vector<1xi32>
    %481 = vector.multi_reduction <add>, %480, %cst_95 [1] : vector<1x5xi32> to vector<1xi32>
    %482 = vector.shape_cast %481 : vector<1xi32> to vector<1x1xi32>
    %c3_i32_96 = arith.constant 3 : i32
    %483 = vector.broadcast %c3_i32_96 : i32 to vector<1x8xi32>
    %484 = arith.cmpi eq, %315, %483 : vector<1x8xi32>
    %485 = vector.shape_cast %482 : vector<1x1xi32> to vector<1x1xi32>
    %486 = vector.broadcast %485 : vector<1x1xi32> to vector<1x8xi32>
    %487 = arith.select %484, %486, %476 : vector<1x8xi1>, vector<1x8xi32>
    %488 = vector.broadcast %482 : vector<1x1xi32> to vector<1x5xi32>
    %489 = arith.cmpi eq, %313, %488 : vector<1x5xi32>
    %c0_i32_97 = arith.constant 0 : i32
    %490 = vector.broadcast %c0_i32_97 : i32 to vector<1x5xi32>
    %491 = arith.select %489, %367, %490 : vector<1x5xi1>, vector<1x5xi32>
    %cst_98 = arith.constant dense<0> : vector<1xi32>
    %492 = vector.multi_reduction <add>, %491, %cst_98 [1] : vector<1x5xi32> to vector<1xi32>
    %493 = vector.shape_cast %492 : vector<1xi32> to vector<1x1xi32>
    %c2_i32 = arith.constant 2 : i32
    %494 = vector.broadcast %c2_i32 : i32 to vector<1x8xi32>
    %495 = arith.cmpi eq, %315, %494 : vector<1x8xi32>
    %496 = vector.shape_cast %493 : vector<1x1xi32> to vector<1x1xi32>
    %497 = vector.broadcast %496 : vector<1x1xi32> to vector<1x8xi32>
    %498 = arith.select %495, %497, %487 : vector<1x8xi1>, vector<1x8xi32>
    %499 = vector.broadcast %493 : vector<1x1xi32> to vector<1x5xi32>
    %500 = arith.cmpi eq, %313, %499 : vector<1x5xi32>
    %c0_i32_99 = arith.constant 0 : i32
    %501 = vector.broadcast %c0_i32_99 : i32 to vector<1x5xi32>
    %502 = arith.select %500, %353, %501 : vector<1x5xi1>, vector<1x5xi32>
    %cst_100 = arith.constant dense<0> : vector<1xi32>
    %503 = vector.multi_reduction <add>, %502, %cst_100 [1] : vector<1x5xi32> to vector<1xi32>
    %504 = vector.shape_cast %503 : vector<1xi32> to vector<1x1xi32>
    %c1_i32 = arith.constant 1 : i32
    %505 = vector.broadcast %c1_i32 : i32 to vector<1x8xi32>
    %506 = arith.cmpi eq, %315, %505 : vector<1x8xi32>
    %507 = vector.shape_cast %504 : vector<1x1xi32> to vector<1x1xi32>
    %508 = vector.broadcast %507 : vector<1x1xi32> to vector<1x8xi32>
    %509 = arith.select %506, %508, %498 : vector<1x8xi1>, vector<1x8xi32>
    %510 = vector.broadcast %504 : vector<1x1xi32> to vector<1x5xi32>
    %511 = arith.cmpi eq, %313, %510 : vector<1x5xi32>
    %c0_i32_101 = arith.constant 0 : i32
    %512 = vector.broadcast %c0_i32_101 : i32 to vector<1x5xi32>
    %513 = arith.select %511, %339, %512 : vector<1x5xi1>, vector<1x5xi32>
    %cst_102 = arith.constant dense<0> : vector<1xi32>
    %514 = vector.multi_reduction <add>, %513, %cst_102 [1] : vector<1x5xi32> to vector<1xi32>
    %515 = vector.shape_cast %514 : vector<1xi32> to vector<1x1xi32>
    %c0_i32_103 = arith.constant 0 : i32
    %516 = vector.broadcast %c0_i32_103 : i32 to vector<1x8xi32>
    %517 = arith.cmpi eq, %315, %516 : vector<1x8xi32>
    %518 = vector.shape_cast %515 : vector<1x1xi32> to vector<1x1xi32>
    %519 = vector.broadcast %518 : vector<1x1xi32> to vector<1x8xi32>
    %520 = arith.select %517, %519, %509 : vector<1x8xi1>, vector<1x8xi32>
    %c0_104 = arith.constant 0 : index
    %c0_105 = arith.constant 0 : index
    %521 = vector.load %arg12[%c0_104, %c0_105] : memref<1x8xi32, #tpu.memory_space<vmem>>, vector<1x8xi32>
    tpu.vector_store %arg12[%c0_104, %c0_105], %520 {strides = array<i32>} : memref<1x8xi32, #tpu.memory_space<vmem>>, vector<1x8xi32>,
    return
  }
}

</mosaic_0001>

<bundles_post_ra>
// kernel: bilstm_crf_forward.1
= control target key start
LH: loop header
LB: loop body
LE: loop exit
PB: predicated region body
PF: predicated region fallthrough
CT: control target
= control target key end

     0   :  { %18 = vsyncpa [#allocation3], 0  ;;  %vm49_vm0 = vcmask 64512   ;;  %v2999_v2 = vmov 0.0   ;;  %vm3000_vm1 = vmmov 0   ;;  %vm133_vm2 = vcmask 1043456   ;;  %s3591_s0 = inlined_call_operand.vmem [shape: f32[8,8], index: 0, kind: input, shape index: {}]   ;;  %s3592_s1 = inlined_call_operand.vmem [shape: f32[8,32], index: 1, kind: input, shape index: {}]   ;;  %s3593_s2 = inlined_call_operand.vmem [shape: f32[1,32], index: 2, kind: input, shape index: {}]   ;;  %s3594_s3 = inlined_call_operand.vmem [shape: f32[4,16], index: 3, kind: input, shape index: {}]   ;;  %s3595_s4 = inlined_call_operand.vmem [shape: f32[4,16], index: 4, kind: input, shape index: {}]   ;;  %s3596_s5 = inlined_call_operand.vmem [shape: f32[2,4], index: 5, kind: input, shape index: {}]   ;;  %s3597_s6 = inlined_call_operand.vmem [shape: f32[2,4], index: 6, kind: input, shape index: {}]   ;;  %s3598_s7 = inlined_call_operand.vmem [shape: f32[8,5], index: 7, kind: input, shape index: {}]   ;;  %s3599_s8 = inlined_call_operand.vmem [shape: f32[1,5], index: 8, kind: input, shape index: {}]   ;;  %s3600_s9 = inlined_call_operand.vmem [shape: f32[5,5], index: 9, kind: input, shape index: {}]   ;;  %s3601_s10 = inlined_call_operand.hbm [shape: f32[8,5], index: 10, kind: output, shape index: {0}]   ;;  %s3602_s11 = inlined_call_operand.hbm [shape: f32[1,1], index: 11, kind: output, shape index: {1}]   ;;  %s3603_s12 = inlined_call_operand.hbm [shape: s32[1,8], index: 12, kind: output, shape index: {2}]  }
   0x1   :  { %v41_v0 = vld [vmem:[%s3592_s1] sm:$0xff]  ;;  %2690 = vmatprep.subr.mxu0 %v2999_v2  ;;  %2692 = vmatprep.mubr.msk.f32.mxu0 %vm3000_vm1, %v2999_v2  ;;  %vm129_vm3 = vcmask 31744  }
   0x2   :  { %v40_v1 = vld [vmem:[%s3591_s0] sm:$0xff]  ;;  %2691 = vmatpush3.msra.mxu0 %v41_v0  ;;  %2695 = vmatprep.subr.mxu1 %v2999_v2 }
   0x3   :  { %v3090_v3 = vld [vmem:[%s3595_s4] sm:$0xf]  ;;  %2693 = vmatmul.mubr.msk.f32.vlgmr.msra.gmra.mrb[0].mxu0 %vm49_vm0, %v40_v1  ;;  %2700 = vmatprep.subr.mxu0 %v2999_v2 }
   0x4   :  { %v3095_v4 = vld [vmem:[%s3594_s3] sm:$0xf] }
   0x5   :  { %v125_v5 = vld [vmem:[%s3596_s5] sm:$0x1] }
   0x6   :  { %19 = vsyncpa [#allocation5], 0  ;;  %2701 = vmatpush3.msk.msra.mxu0 %vm133_vm2, %v3090_v3  ;;  %2696 = vmatpush3.msk.msra.mxu1 %vm133_vm2, %v3095_v4  ;;  %v127_v6 = vld [vmem:[%s3596_s5 + $0x1] sm:$0x1]  ;;  %s3001_s30 = smov 20   ;;  %s3002_s13 = smov 16  }
   0x7   :  { %2697 = vmatprep.mubr.msk.f32.mxu1 %vm3000_vm1, %v2999_v2  ;;  %2702 = vmatprep.mubr.msk.f32.mxu0 %vm3000_vm1, %v2999_v2  ;;  %v128_v7 = vld [vmem:[%s3597_s6 + $0x1] sm:$0x1]  ;;  %v2597_v16 = vld [vmem:[%s3593_s2] ss:$0 sm:$0xff]  ;;  %s3003_s16 = smov 120   ;;  %s3004_s17 = smov 4  }
   0x8   :  { %2698 = vmatmul.mubr.msk.f32.vlgmr.msra.gmra.mrb[0].mxu1 %vm129_vm3, %v125_v5  ;;  %2710 = vmatprep.subr.mxu0 %v2999_v2  ;;  %v326_v8 = vrot.slane %v128_v7, 1  ;;  %s3005_s2 = smov 8   ;;  %v126_v34 = vld [vmem:[%s3597_s6] sm:$0x1]  ;;  %s3006_s20 = smov 100   ;;  %vm1857_vm4 = vcmask 1040384  }
   0x9   :  { %2703 = vmatmul.mubr.msk.f32.vlgmr.msra.gmra.mrb[2].mxu0 %vm129_vm3, %v127_v6  ;;  %2705 = vmatprep.subr.mxu1 %v2999_v2  ;;  %s3007_s6 = smov 116   ;;  %vm1859_vm5 = vcmask 1041408   ;;  %vm1861_vm6 = vcmask 1042432   ;;  %vm1864_vm7 = vcmask 1044480   ;;  %vm1866_vm8 = vcmask 1045504   ;;  %s3011_s1 = smov [#allocation2]  }
   0xa   :  { %2711 = vmatpush3.msk.msra.mxu0 %vm133_vm2, %v3090_v3  ;;  %2712 = vmatprep.mubr.msk.f32.mxu0 %vm3000_vm1, %v2999_v2  ;;  %vm1868_vm9 = vcmask 1046528   ;;  %vm2051_vm11 = vcmask 36864   ;;  %vm2043_vm12 = vcmask 39936   ;;  %vm2372_vm15 = vcmask 4096   ;;  %s2562_s0 = sshll.u32 %s3011_s1, 4  ;;  %s2563_s0 = int_to_ptr.vmem [resolvable:$true] %s2562_s0 }
   0xb   :  { %2706 = vmatpush3.msk.msra.mxu1 %vm133_vm2, %v3095_v4  ;;  %2707 = vmatprep.mubr.msk.f32.mxu1 %vm3000_vm1, %v2999_v2  ;;  %vm2400_vm0 = vcmask 0  }
   0xc   :  { %2720 = vmatprep.subr.mxu0 %v2999_v2  ;;  %2715 = vmatprep.subr.mxu1 %v2999_v2 }
   0xd   :  { %327 = vrot.lane.b32.xlu1 %v326_v8, %s3001_s30 }
  0x7f   :  { %v328_v27 = vpop.permute.xlu1 %327 }
  0xd6   :  { %v119_v9 = vpop.f32.mrb[0].mxu0 }
  0xd7   :  { %v2694_v10 = vpop.f32.mrb[1].mxu0  ;;  %v3134_v17 = vadd.f32 %v2597_v16, %v119_v9 }
  0xdb   :  { %v203_v11 = vpop.f32.mrb[0].mxu1 }
  0xdc   :  { %v308_v12 = vpop.f32.mrb[2].mxu0  ;;  %v2699_v13 = vpop.f32.mrb[1].mxu1  ;;  %v207_v31 = vadd.f32 %v203_v11, %v3134_v17 }
  0xdd   :  { %v313_v14 = vrot.slane %v308_v12, 1  ;;  %v2704_v15 = vpop.f32.mrb[3].mxu0 }
  0xde   :  { %v2601_v39 = vmul.f32 -1.442695, %v207_v31 }
  0xdf   :  { %314 = vrot.lane.b32.xlu0 %v313_v14, %s3002_s13 }
 0x151   :  { %v315_v18 = vpop.permute.xlu0 %314 }
 0x152   :  { %v317_v19 = vadd.f32 %v315_v18, %v3134_v17 }
 0x154   :  { %2801 = vtanh.f32 %v317_v19  ;;  %v2604_v21 = vmul.f32 -1.442695, %v317_v19 }
 0x156   :  { %2803 = vpow2.f32 %v2604_v21 }
 0x15e   :  { %v2802_v20 = vpop.eup %2801 }
 0x15f   :  { %332 = vrot.lane.b32.xlu0 %v2802_v20, %s3003_s16 }
 0x160   :  { %v2804_v22 = vpop.eup %2803 }
 0x161   :  { %v321_v23 = vadd.f32 1.0, %v2804_v22 }
 0x163   :  { %2805 = vrcp.f32 %v321_v23 }
 0x16d   :  { %v2806_v24 = vpop.eup %2805 }
 0x16e   :  { %v330_v28 = vmul.f32 %v2806_v24, %v328_v27 }
 0x1d1   :  { %v333_v25 = vpop.permute.xlu0 %332 }
 0x1d2   :  { %v335_v26 = vmul.f32 %v2806_v24, %v333_v25 }
 0x1d4   :  { %337 = vrot.lane.b32.xlu1 %v335_v26, %s3004_s17 }
 0x246   :  { %v338_v29 = vpop.permute.xlu1 %337 }
 0x247   :  { %v340_v30 = vadd.f32 %v338_v29, %v330_v28 }
 0x249   :  { %2807 = vtanh.f32 %v340_v30  ;;  %v543_v0 = vrot.slane %v340_v30, 1 }
 0x24a   :  { %2809 = vtanh.f32 %v207_v31 }
 0x24b   :  { %2811 = vpow2.f32 %v2601_v39 }
 0x253   :  { %v2808_v32 = vpop.eup %2807 }
 0x254   :  { %343 = vrot.lane.b32.xlu0 %v2808_v32, %s3005_s2  ;;  %v2810_v33 = vpop.eup %2809 }
 0x255   :  { %v2812_v40 = vpop.eup %2811 }
 0x256   :  { %v211_v41 = vadd.f32 1.0, %v2812_v40 }
 0x258   :  { %221 = vrot.lane.b32.xlu0 %v2810_v33, %s3003_s16  ;;  %2813 = vrcp.f32 %v211_v41 }
 0x25c   :  { %216 = vrot.lane.b32.xlu0 %v126_v34, %s3004_s17 }
 0x262   :  { %v2814_v46 = vpop.eup %2813 }
 0x2c6   :  { %v344_v35 = vpop.permute.xlu0 %343 }
 0x2c7   :  { %v3146_v36 = vmul.f32 %v2806_v24, %v344_v35 }
 0x2c9   :  { %v454_v37 = vrot.slane %v3146_v36, 7 }
 0x2ca   :  { %v222_v45 = vpop.permute.xlu0 %221 }
 0x2cb   :  { %455 = vrot.lane.b32.xlu1 %v454_v37, %s3006_s20  ;;  %v224_v47 = vmul.f32 %v2814_v46, %v222_v45 }
 0x2ce   :  { %v217_v48 = vpop.permute.xlu0 %216 }
 0x2cf   :  { %v219_v51 = vmul.f32 %v2814_v46, %v217_v48 }
 0x33d   :  { %v456_v38 = vpop.permute.xlu1 %455 }
 0x33e   :  { %2713 = vmatmul.mubr.msk.f32.vlgmr.msra.gmra.mrb[4].mxu0 %vm129_vm3, %v456_v38 }
 0x33f   :  { %2721 = vmatpush3.msk.msra.mxu0 %vm133_vm2, %v3090_v3  ;;  %2722 = vmatprep.mubr.msk.f32.mxu0 %vm3000_vm1, %v2999_v2 }
 0x340   :  { %2730 = vmatprep.subr.mxu0 %v2999_v2 }
 0x411   :  { %v525_v42 = vpop.f32.mrb[4].mxu0 }
 0x412   :  { %v530_v43 = vrot.slane %v525_v42, 2  ;;  %v2714_v44 = vpop.f32.mrb[5].mxu0 }
 0x414   :  { %531 = vrot.lane.b32.xlu1 %v530_v43, %s3002_s13 }
 0x418   :  { %226 = vrot.lane.b32.xlu1 %v224_v47, %s3004_s17 }
 0x486   :  { %v532_v49 = vpop.permute.xlu1 %531 }
 0x487   :  { %v534_v50 = vadd.f32 %v532_v49, %v3134_v17 }
 0x489   :  { %2815 = vtanh.f32 %v534_v50  ;;  %v2610_v56 = vmul.f32 -1.442695, %v534_v50 }
 0x48a   :  { %v227_v52 = vpop.permute.xlu1 %226 }
 0x48b   :  { %v229_v53 = vadd.f32 %v227_v52, %v219_v51 }
 0x48d   :  { %2817 = vtanh.f32 %v229_v53  ;;  %v434_v26 = vrot.slane %v229_v53, 7 }
 0x48e   :  { %2819 = vpow2.f32 %v2610_v56 }
 0x493   :  { %v2816_v54 = vpop.eup %2815 }
 0x494   :  { %547 = vrot.lane.b32.xlu0 %v2816_v54, %s3003_s16 }
 0x497   :  { %v2818_v55 = vpop.eup %2817 }
 0x498   :  { %232 = vrot.lane.b32.xlu1 %v2818_v55, %s3005_s2  ;;  %v2820_v57 = vpop.eup %2819 }
 0x499   :  { %v538_v58 = vadd.f32 1.0, %v2820_v57 }
 0x49b   :  { %2821 = vrcp.f32 %v538_v58 }
 0x4a5   :  { %v2822_v59 = vpop.eup %2821 }
 0x4a6   :  { %v545_v1 = vmul.f32 %v2822_v59, %v543_v0 }
 0x506   :  { %v548_v60 = vpop.permute.xlu0 %547 }
 0x507   :  { %v550_v61 = vmul.f32 %v2822_v59, %v548_v60 }
 0x509   :  { %552 = vrot.lane.b32.xlu0 %v550_v61, %s3004_s17 }
 0x50a   :  { %v233_v62 = vpop.permute.xlu1 %232 }
 0x50b   :  { %v3162_v63 = vmul.f32 %v2814_v46, %v233_v62 }
 0x50d   :  { %348 = vrot.lane.b32.xlu1 %v3162_v63, %s3007_s6 }
 0x57b   :  { %v553_v5 = vpop.permute.xlu0 %552 }
 0x57c   :  { %v3166_v6 = vadd.f32 %v553_v5, %v545_v1 }
 0x57e   :  { %2823 = vtanh.f32 %v3166_v6  ;;  %v759_v47 = vrot.slane %v3166_v6, 1 }
 0x57f   :  { %v349_v7 = vpop.permute.xlu1 %348 }
 0x580   :  { %2708 = vmatmul.mubr.msk.f32.vlgmr.msra.gmra.mrb[2].mxu1 %vm129_vm3, %v349_v7 }
 0x581   :  { %2716 = vmatpush3.msk.msra.mxu1 %vm133_vm2, %v3095_v4  ;;  %2717 = vmatprep.mubr.msk.f32.mxu1 %vm3000_vm1, %v2999_v2 }
 0x582   :  { %2725 = vmatprep.subr.mxu1 %v2999_v2 }
 0x588   :  { %v2824_v8 = vpop.eup %2823 }
 0x589   :  { %558 = vrot.lane.b32.xlu0 %v2824_v8, %s3005_s2 }
 0x5fb   :  { %v559_v9 = vpop.permute.xlu0 %558 }
 0x5fc   :  { %v3176_v10 = vmul.f32 %v2822_v59, %v559_v9 }
 0x5fe   :  { %v670_v11 = vrot.slane %v3176_v10, 6 }
 0x600   :  { %671 = vrot.lane.b32.xlu1 %v670_v11, %s3006_s20 }
 0x653   :  { %v418_v12 = vpop.f32.mrb[2].mxu1 }
 0x654   :  { %v423_v13 = vrot.slane %v418_v12, 7  ;;  %v2709_v14 = vpop.f32.mrb[3].mxu1 }
 0x656   :  { %v425_v15 = vadd.f32 %v423_v13, %v3134_v17 }
 0x658   :  { %2825 = vtanh.f32 %v425_v15  ;;  %v2607_v19 = vmul.f32 -1.442695, %v425_v15 }
 0x65a   :  { %2827 = vpow2.f32 %v2607_v19 }
 0x662   :  { %v2826_v16 = vpop.eup %2825 }
 0x663   :  { %438 = vrot.lane.b32.xlu0 %v2826_v16, %s3003_s16 }
 0x664   :  { %v2828_v20 = vpop.eup %2827 }
 0x665   :  { %v429_v21 = vadd.f32 1.0, %v2828_v20 }
 0x667   :  { %2829 = vrcp.f32 %v429_v21 }
 0x671   :  { %v2830_v22 = vpop.eup %2829 }
 0x672   :  { %v672_v18 = vpop.permute.xlu1 %671  ;;  %v436_v29 = vmul.f32 %v2830_v22, %v434_v26 }
 0x673   :  { %2723 = vmatmul.mubr.msk.f32.vlgmr.msra.gmra.mrb[6].mxu0 %vm129_vm3, %v672_v18 }
 0x674   :  { %2731 = vmatpush3.msk.msra.mxu0 %vm133_vm2, %v3090_v3  ;;  %2732 = vmatprep.mubr.msk.f32.mxu0 %vm3000_vm1, %v2999_v2 }
 0x675   :  { %2740 = vmatprep.subr.mxu0 %v2999_v2 }
 0x6d5   :  { %v439_v23 = vpop.permute.xlu0 %438 }
 0x6d6   :  { %v441_v24 = vmul.f32 %v2830_v22, %v439_v23 }
 0x6d8   :  { %443 = vrot.lane.b32.xlu1 %v441_v24, %s3004_s17 }
 0x746   :  { %v741_v25 = vpop.f32.mrb[6].mxu0 }
 0x747   :  { %v746_v27 = vrot.slane %v741_v25, 3  ;;  %v2724_v28 = vpop.f32.mrb[7].mxu0 }
 0x749   :  { %747 = vrot.lane.b32.xlu0 %v746_v27, %s3002_s13 }
 0x74a   :  { %v444_v30 = vpop.permute.xlu1 %443 }
 0x74b   :  { %v446_v31 = vadd.f32 %v444_v30, %v436_v29 }
 0x74d   :  { %2831 = vtanh.f32 %v446_v31  ;;  %v650_v7 = vrot.slane %v446_v31, 7 }
 0x757   :  { %v2832_v32 = vpop.eup %2831 }
 0x758   :  { %449 = vrot.lane.b32.xlu1 %v2832_v32, %s3005_s2 }
 0x7bb   :  { %v748_v33 = vpop.permute.xlu0 %747 }
 0x7bc   :  { %v750_v34 = vadd.f32 %v748_v33, %v3134_v17 }
 0x7be   :  { %2833 = vtanh.f32 %v750_v34  ;;  %v2616_v40 = vmul.f32 -1.442695, %v750_v34 }
 0x7c0   :  { %2835 = vpow2.f32 %v2616_v40 }
 0x7c8   :  { %v2834_v35 = vpop.eup %2833 }
 0x7c9   :  { %763 = vrot.lane.b32.xlu0 %v2834_v35, %s3003_s16 }
 0x7ca   :  { %v450_v37 = vpop.permute.xlu1 %449  ;;  %v2836_v41 = vpop.eup %2835 }
 0x7cb   :  { %v3193_v38 = vmul.f32 %v2830_v22, %v450_v37  ;;  %v754_v42 = vadd.f32 1.0, %v2836_v41 }
 0x7cd   :  { %v563_v39 = vrot.slane %v3193_v38, 1  ;;  %2837 = vrcp.f32 %v754_v42  ;;  %v1858_v19 = vsel %vm1857_vm4, %v3162_v63, %v3193_v38 }
 0x7cf   :  { %564 = vrot.lane.b32.xlu1 %v563_v39, %s3007_s6 }
 0x7d7   :  { %v2838_v43 = vpop.eup %2837 }
 0x7d8   :  { %v761_v48 = vmul.f32 %v2838_v43, %v759_v47 }
 0x83b   :  { %v764_v44 = vpop.permute.xlu0 %763 }
 0x83c   :  { %v766_v45 = vmul.f32 %v2838_v43, %v764_v44 }
 0x83e   :  { %768 = vrot.lane.b32.xlu0 %v766_v45, %s3004_s17 }
 0x841   :  { %v565_v46 = vpop.permute.xlu1 %564 }
 0x842   :  { %2718 = vmatmul.mubr.msk.f32.vlgmr.msra.gmra.mrb[4].mxu1 %vm129_vm3, %v565_v46 }
 0x843   :  { %2726 = vmatpush3.msk.msra.mxu1 %vm133_vm2, %v3095_v4  ;;  %2727 = vmatprep.mubr.msk.f32.mxu1 %vm3000_vm1, %v2999_v2 }
 0x844   :  { %2735 = vmatprep.subr.mxu1 %v2999_v2 }
 0x8b0   :  { %v769_v49 = vpop.permute.xlu0 %768 }
 0x8b1   :  { %v3205_v50 = vadd.f32 %v769_v49, %v761_v48 }
 0x8b3   :  { %2839 = vtanh.f32 %v3205_v50  ;;  %v975_v33 = vrot.slane %v3205_v50, 1 }
 0x8bd   :  { %v2840_v51 = vpop.eup %2839 }
 0x8be   :  { %774 = vrot.lane.b32.xlu1 %v2840_v51, %s3005_s2 }
 0x915   :  { %v634_v52 = vpop.f32.mrb[4].mxu1 }
 0x916   :  { %v639_v53 = vrot.slane %v634_v52, 6  ;;  %v2719_v54 = vpop.f32.mrb[5].mxu1 }
 0x918   :  { %v641_v55 = vadd.f32 %v639_v53, %v3134_v17 }
 0x91a   :  { %2841 = vtanh.f32 %v641_v55  ;;  %v2613_v60 = vmul.f32 -1.442695, %v641_v55 }
 0x91c   :  { %2843 = vpow2.f32 %v2613_v60 }
 0x924   :  { %v2842_v56 = vpop.eup %2841 }
 0x925   :  { %654 = vrot.lane.b32.xlu1 %v2842_v56, %s3003_s16 }
 0x926   :  { %v2844_v61 = vpop.eup %2843 }
 0x927   :  { %v645_v62 = vadd.f32 1.0, %v2844_v61 }
 0x929   :  { %2845 = vrcp.f32 %v645_v62 }
 0x930   :  { %v775_v57 = vpop.permute.xlu1 %774 }
 0x931   :  { %v3211_v58 = vmul.f32 %v2838_v43, %v775_v57 }
 0x933   :  { %v886_v59 = vrot.slane %v3211_v58, 5  ;;  %v2846_v0 = vpop.eup %2845 }
 0x934   :  { %v652_v8 = vmul.f32 %v2846_v0, %v650_v7 }
 0x935   :  { %887 = vrot.lane.b32.xlu0 %v886_v59, %s3006_s20 }
 0x997   :  { %v655_v1 = vpop.permute.xlu1 %654 }
 0x998   :  { %v657_v5 = vmul.f32 %v2846_v0, %v655_v1 }
 0x99a   :  { %659 = vrot.lane.b32.xlu0 %v657_v5, %s3004_s17 }
 0x9a7   :  { %v888_v6 = vpop.permute.xlu0 %887 }
 0x9a8   :  { %2733 = vmatmul.mubr.msk.f32.vlgmr.msra.gmra.mrb[8].mxu0 %vm129_vm3, %v888_v6 }
 0x9a9   :  { %2741 = vmatpush3.msk.msra.mxu0 %vm133_vm2, %v3090_v3  ;;  %2742 = vmatprep.mubr.msk.f32.mxu0 %vm3000_vm1, %v2999_v2 }
 0x9aa   :  { %2750 = vmatprep.subr.mxu0 %v2999_v2 }
 0xa0c   :  { %v660_v9 = vpop.permute.xlu0 %659 }
 0xa0d   :  { %v3222_v11 = vadd.f32 %v660_v9, %v652_v8 }
 0xa0f   :  { %2847 = vtanh.f32 %v3222_v11  ;;  %v866_v52 = vrot.slane %v3222_v11, 7 }
 0xa19   :  { %v2848_v12 = vpop.eup %2847 }
 0xa1a   :  { %665 = vrot.lane.b32.xlu1 %v2848_v12, %s3005_s2 }
 0xa7b   :  { %v957_v13 = vpop.f32.mrb[8].mxu0 }
 0xa7c   :  { %v962_v14 = vrot.slane %v957_v13, 4  ;;  %v2734_v15 = vpop.f32.mrb[9].mxu0 }
 0xa7e   :  { %963 = vrot.lane.b32.xlu0 %v962_v14, %s3002_s13 }
 0xa8c   :  { %v666_v16 = vpop.permute.xlu1 %665 }
 0xa8d   :  { %v668_v18 = vmul.f32 %v2846_v0, %v666_v16 }
 0xa8f   :  { %v779_v20 = vrot.slane %v668_v18, 2  ;;  %v3231_v21 = vsel %vm1859_vm5, %v1858_v19, %v668_v18 }
 0xa91   :  { %780 = vrot.lane.b32.xlu1 %v779_v20, %s3007_s6 }
 0xaf0   :  { %v964_v22 = vpop.permute.xlu0 %963 }
 0xaf1   :  { %v966_v23 = vadd.f32 %v964_v22, %v3134_v17 }
 0xaf3   :  { %2849 = vtanh.f32 %v966_v23  ;;  %v2622_v63 = vmul.f32 -1.442695, %v966_v23 }
 0xaf5   :  { %2851 = vpow2.f32 %v2622_v63 }
 0xafd   :  { %v2850_v24 = vpop.eup %2849 }
 0xafe   :  { %979 = vrot.lane.b32.xlu0 %v2850_v24, %s3003_s16 }
 0xaff   :  { %v2852_v26 = vpop.eup %2851 }
 0xb00   :  { %v970_v27 = vadd.f32 1.0, %v2852_v26 }
 0xb02   :  { %2853 = vrcp.f32 %v970_v27 }
 0xb03   :  { %v781_v25 = vpop.permute.xlu1 %780 }
 0xb04   :  { %2728 = vmatmul.mubr.msk.f32.vlgmr.msra.gmra.mrb[6].mxu1 %vm129_vm3, %v781_v25 }
 0xb05   :  { %2736 = vmatpush3.msk.msra.mxu1 %vm133_vm2, %v3095_v4  ;;  %2737 = vmatprep.mubr.msk.f32.mxu1 %vm3000_vm1, %v2999_v2 }
 0xb06   :  { %2745 = vmatprep.subr.mxu1 %v2999_v2 }
 0xb0c   :  { %v2854_v28 = vpop.eup %2853 }
 0xb0d   :  { %v977_v35 = vmul.f32 %v2854_v28, %v975_v33 }
 0xb70   :  { %v980_v29 = vpop.permute.xlu0 %979 }
 0xb71   :  { %v982_v30 = vmul.f32 %v2854_v28, %v980_v29 }
 0xb73   :  { %984 = vrot.lane.b32.xlu1 %v982_v30, %s3004_s17 }
 0xbd7   :  { %v850_v31 = vpop.f32.mrb[6].mxu1 }
 0xbd8   :  { %v2729_v32 = vpop.f32.mrb[7].mxu1  ;;  %v855_v34 = vrot.slane %v850_v31, 5 }
 0xbda   :  { %v857_v39 = vadd.f32 %v855_v34, %v3134_v17 }
 0xbdc   :  { %v2619_v42 = vmul.f32 -1.442695, %v857_v39 }
 0xbe5   :  { %v985_v37 = vpop.permute.xlu1 %984 }
 0xbe6   :  { %v3244_v38 = vadd.f32 %v985_v37, %v977_v35 }
 0xbe8   :  { %2855 = vtanh.f32 %v3244_v38  ;;  %v1191_v23 = vrot.slane %v3244_v38, 1 }
 0xbe9   :  { %2857 = vtanh.f32 %v857_v39 }
 0xbea   :  { %2859 = vpow2.f32 %v2619_v42 }
 0xbf2   :  { %v2856_v40 = vpop.eup %2855 }
 0xbf3   :  { %990 = vrot.lane.b32.xlu0 %v2856_v40, %s3005_s2  ;;  %v2858_v41 = vpop.eup %2857 }
 0xbf4   :  { %v2860_v43 = vpop.eup %2859 }
 0xbf5   :  { %v861_v44 = vadd.f32 1.0, %v2860_v43 }
 0xbf7   :  { %870 = vrot.lane.b32.xlu0 %v2858_v41, %s3003_s16  ;;  %2861 = vrcp.f32 %v861_v44 }
 0xc01   :  { %v2862_v49 = vpop.eup %2861 }
 0xc02   :  { %v868_v53 = vmul.f32 %v2862_v49, %v866_v52 }
 0xc65   :  { %v991_v45 = vpop.permute.xlu0 %990 }
 0xc66   :  { %v3250_v46 = vmul.f32 %v2854_v28, %v991_v45 }
 0xc68   :  { %v1102_v47 = vrot.slane %v3250_v46, 4 }
 0xc69   :  { %v871_v48 = vpop.permute.xlu0 %870 }
 0xc6a   :  { %1103 = vrot.lane.b32.xlu1 %v1102_v47, %s3006_s20  ;;  %v873_v50 = vmul.f32 %v2862_v49, %v871_v48 }
 0xc6e   :  { %875 = vrot.lane.b32.xlu1 %v873_v50, %s3004_s17 }
 0xcdc   :  { %v1104_v51 = vpop.permute.xlu1 %1103 }
 0xcdd   :  { %2743 = vmatmul.mubr.msk.f32.vlgmr.msra.gmra.mrb[10].mxu0 %vm129_vm3, %v1104_v51 }
 0xcde   :  { %2751 = vmatpush3.msk.msra.mxu0 %vm133_vm2, %v3090_v3  ;;  %2752 = vmatprep.mubr.msk.f32.mxu0 %vm3000_vm1, %v2999_v2 }
 0xcdf   :  { %2760 = vmatprep.subr.mxu0 %v2999_v2 }
 0xce0   :  { %v876_v54 = vpop.permute.xlu1 %875 }
 0xce1   :  { %v878_v55 = vadd.f32 %v876_v54, %v868_v53 }
 0xce3   :  { %2863 = vtanh.f32 %v878_v55  ;;  %v1082_v35 = vrot.slane %v878_v55, 7 }
 0xced   :  { %v2864_v56 = vpop.eup %2863 }
 0xcee   :  { %881 = vrot.lane.b32.xlu0 %v2864_v56, %s3005_s2 }
 0xd60   :  { %v882_v57 = vpop.permute.xlu0 %881 }
 0xd61   :  { %v884_v59 = vmul.f32 %v2862_v49, %v882_v57 }
 0xd63   :  { %v995_v60 = vrot.slane %v884_v59, 3  ;;  %v3265_v61 = vsel %vm1861_vm6, %v3231_v21, %v884_v59 }
 0xd65   :  { %996 = vrot.lane.b32.xlu1 %v995_v60, %s3007_s6 }
 0xdb0   :  { %v1173_v62 = vpop.f32.mrb[10].mxu0 }
 0xdb1   :  { %v1178_v0 = vrot.slane %v1173_v62, 5  ;;  %v2744_v1 = vpop.f32.mrb[11].mxu0 }
 0xdb3   :  { %1179 = vrot.lane.b32.xlu0 %v1178_v0, %s3002_s13 }
 0xdd7   :  { %v997_v5 = vpop.permute.xlu1 %996 }
 0xdd8   :  { %2738 = vmatmul.mubr.msk.f32.vlgmr.msra.gmra.mrb[8].mxu1 %vm129_vm3, %v997_v5 }
 0xdd9   :  { %2746 = vmatpush3.msk.msra.mxu1 %vm133_vm2, %v3095_v4  ;;  %2747 = vmatprep.mubr.msk.f32.mxu1 %vm3000_vm1, %v2999_v2 }
 0xdda   :  { %2755 = vmatprep.subr.mxu1 %v2999_v2 }
 0xe25   :  { %v1180_v6 = vpop.permute.xlu0 %1179 }
 0xe26   :  { %v1182_v7 = vadd.f32 %v1180_v6, %v3134_v17 }
 0xe28   :  { %2865 = vtanh.f32 %v1182_v7  ;;  %v2628_v9 = vmul.f32 -1.442695, %v1182_v7 }
 0xe2a   :  { %2867 = vpow2.f32 %v2628_v9 }
 0xe32   :  { %v2866_v8 = vpop.eup %2865 }
 0xe33   :  { %1195 = vrot.lane.b32.xlu1 %v2866_v8, %s3003_s16 }
 0xe34   :  { %v2868_v11 = vpop.eup %2867 }
 0xe35   :  { %v1186_v12 = vadd.f32 1.0, %v2868_v11 }
 0xe37   :  { %2869 = vrcp.f32 %v1186_v12 }
 0xe41   :  { %v2870_v13 = vpop.eup %2869 }
 0xe42   :  { %v1193_v24 = vmul.f32 %v2870_v13, %v1191_v23 }
 0xea5   :  { %v1196_v14 = vpop.permute.xlu1 %1195 }
 0xea6   :  { %v1198_v15 = vmul.f32 %v2870_v13, %v1196_v14 }
 0xea8   :  { %1200 = vrot.lane.b32.xlu0 %v1198_v15, %s3004_s17 }
 0xeab   :  { %v1066_v16 = vpop.f32.mrb[8].mxu1 }
 0xeac   :  { %v1071_v18 = vrot.slane %v1066_v16, 4  ;;  %v2739_v19 = vpop.f32.mrb[9].mxu1 }
 0xeae   :  { %v1073_v20 = vadd.f32 %v1071_v18, %v3134_v17 }
 0xeb0   :  { %2871 = vtanh.f32 %v1073_v20  ;;  %v2625_v22 = vmul.f32 -1.442695, %v1073_v20 }
 0xeb2   :  { %2873 = vpow2.f32 %v2625_v22 }
 0xeba   :  { %v2872_v21 = vpop.eup %2871 }
 0xebb   :  { %1086 = vrot.lane.b32.xlu0 %v2872_v21, %s3003_s16 }
 0xebc   :  { %v2874_v26 = vpop.eup %2873 }
 0xebd   :  { %v1077_v27 = vadd.f32 1.0, %v2874_v26 }
 0xf1a   :  { %v1201_v25 = vpop.permute.xlu0 %1200 }
 0xf1b   :  { %v3281_v63 = vadd.f32 %v1201_v25, %v1193_v24 }
 0xf1d   :  { %2875 = vtanh.f32 %v3281_v63 }
 0xf1e   :  { %2877 = vrcp.f32 %v1077_v27 }
 0xf27   :  { %v2876_v28 = vpop.eup %2875 }
 0xf28   :  { %1206 = vrot.lane.b32.xlu1 %v2876_v28, %s3005_s2  ;;  %v2878_v29 = vpop.eup %2877 }
 0xf29   :  { %v1084_v37 = vmul.f32 %v2878_v29, %v1082_v35 }
 0xf2d   :  { %v1087_v30 = vpop.permute.xlu0 %1086 }
 0xf2e   :  { %v1089_v31 = vmul.f32 %v2878_v29, %v1087_v30 }
 0xf30   :  { %1091 = vrot.lane.b32.xlu0 %v1089_v31, %s3004_s17 }
 0xf9a   :  { %v1207_v32 = vpop.permute.xlu1 %1206 }
 0xf9b   :  { %v3286_v33 = vmul.f32 %v2870_v13, %v1207_v32  ;;  %v1407_v13 = vrot.slane %v3281_v63, 1 }
 0xf9d   :  { %v1318_v34 = vrot.slane %v3286_v33, 3 }
 0xf9f   :  { %1319 = vrot.lane.b32.xlu1 %v1318_v34, %s3006_s20 }
 0xfa2   :  { %v1092_v38 = vpop.permute.xlu0 %1091 }
 0xfa3   :  { %v1094_v39 = vadd.f32 %v1092_v38, %v1084_v37 }
 0xfa5   :  { %2879 = vtanh.f32 %v1094_v39  ;;  %v1298_v19 = vrot.slane %v1094_v39, 7 }
 0xfaf   :  { %v2880_v40 = vpop.eup %2879 }
 0xfb0   :  { %1097 = vrot.lane.b32.xlu1 %v2880_v40, %s3005_s2 }
0x1011   :  { %v1320_v41 = vpop.permute.xlu1 %1319 }
0x1012   :  { %2753 = vmatmul.mubr.msk.f32.vlgmr.msra.gmra.mrb[12].mxu0 %vm129_vm3, %v1320_v41 }
0x1013   :  { %2761 = vmatpush3.msk.msra.mxu0 %vm133_vm2, %v3090_v3  ;;  %2762 = vmatprep.mubr.msk.f32.mxu0 %vm3000_vm1, %v2999_v2 }
0x1014   :  { %2770 = vmatprep.subr.mxu0 %v2999_v2 }
0x1022   :  { %v1098_v42 = vpop.permute.xlu1 %1097 }
0x1023   :  { %v1100_v43 = vmul.f32 %v2878_v29, %v1098_v42 }
0x1025   :  { %v1211_v44 = vrot.slane %v1100_v43, 4  ;;  %v3299_v45 = vsel %vm133_vm2, %v3265_v61, %v1100_v43 }
0x1027   :  { %1212 = vrot.lane.b32.xlu0 %v1211_v44, %s3007_s6 }
0x1099   :  { %v1213_v47 = vpop.permute.xlu0 %1212 }
0x109a   :  { %2748 = vmatmul.mubr.msk.f32.vlgmr.msra.gmra.mrb[10].mxu1 %vm129_vm3, %v1213_v47 }
0x109b   :  { %2756 = vmatpush3.msk.msra.mxu1 %vm133_vm2, %v3095_v4  ;;  %2757 = vmatprep.mubr.msk.f32.mxu1 %vm3000_vm1, %v2999_v2 }
0x109c   :  { %2765 = vmatprep.subr.mxu1 %v2999_v2 }
0x10e5   :  { %v1389_v48 = vpop.f32.mrb[12].mxu0 }
0x10e6   :  { %v1394_v49 = vrot.slane %v1389_v48, 6  ;;  %v2754_v50 = vpop.f32.mrb[13].mxu0 }
0x10e8   :  { %1395 = vrot.lane.b32.xlu1 %v1394_v49, %s3002_s13 }
0x115a   :  { %v1396_v51 = vpop.permute.xlu1 %1395 }
0x115b   :  { %v1398_v52 = vadd.f32 %v1396_v51, %v3134_v17 }
0x115d   :  { %2881 = vtanh.f32 %v1398_v52  ;;  %v2634_v60 = vmul.f32 -1.442695, %v1398_v52 }
0x1167   :  { %v2882_v53 = vpop.eup %2881 }
0x1168   :  { %1411 = vrot.lane.b32.xlu0 %v2882_v53, %s3003_s16 }
0x116d   :  { %v1282_v54 = vpop.f32.mrb[10].mxu1 }
0x116e   :  { %v1287_v55 = vrot.slane %v1282_v54, 3  ;;  %v2749_v56 = vpop.f32.mrb[11].mxu1 }
0x1170   :  { %v1289_v57 = vadd.f32 %v1287_v55, %v3134_v17 }
0x1172   :  { %2883 = vtanh.f32 %v1289_v57  ;;  %v2631_v0 = vmul.f32 -1.442695, %v1289_v57 }
0x1173   :  { %2885 = vpow2.f32 %v2634_v60 }
0x117c   :  { %v2884_v59 = vpop.eup %2883 }
0x117d   :  { %1302 = vrot.lane.b32.xlu0 %v2884_v59, %s3003_s16  ;;  %v2886_v61 = vpop.eup %2885 }
0x117e   :  { %v1402_v62 = vadd.f32 1.0, %v2886_v61 }
0x1180   :  { %2887 = vrcp.f32 %v1402_v62 }
0x1181   :  { %2889 = vpow2.f32 %v2631_v0 }
0x118a   :  { %v2888_v1 = vpop.eup %2887 }
0x118b   :  { %v2890_v7 = vpop.eup %2889  ;;  %v1409_v14 = vmul.f32 %v2888_v1, %v1407_v13 }
0x118c   :  { %v1293_v8 = vadd.f32 1.0, %v2890_v7 }
0x118e   :  { %2891 = vrcp.f32 %v1293_v8 }
0x1198   :  { %v2892_v9 = vpop.eup %2891 }
0x1199   :  { %v1300_v20 = vmul.f32 %v2892_v9, %v1298_v19 }
0x11da   :  { %v1412_v5 = vpop.permute.xlu0 %1411 }
0x11db   :  { %v1414_v6 = vmul.f32 %v2888_v1, %v1412_v5 }
0x11dd   :  { %1416 = vrot.lane.b32.xlu1 %v1414_v6, %s3004_s17 }
0x11ef   :  { %v1303_v11 = vpop.permute.xlu0 %1302 }
0x11f0   :  { %v1305_v12 = vmul.f32 %v2892_v9, %v1303_v11 }
0x11f2   :  { %1307 = vrot.lane.b32.xlu0 %v1305_v12, %s3004_s17 }
0x124f   :  { %v1417_v15 = vpop.permute.xlu1 %1416 }
0x1250   :  { %v3316_v16 = vadd.f32 %v1417_v15, %v1409_v14 }
0x1252   :  { %2893 = vtanh.f32 %v3316_v16  ;;  %v1623_v56 = vrot.slane %v3316_v16, 1 }
0x125c   :  { %v2894_v18 = vpop.eup %2893 }
0x125d   :  { %1422 = vrot.lane.b32.xlu1 %v2894_v18, %s3005_s2 }
0x1264   :  { %v1308_v21 = vpop.permute.xlu0 %1307 }
0x1265   :  { %v3320_v22 = vadd.f32 %v1308_v21, %v1300_v20 }
0x1267   :  { %2895 = vtanh.f32 %v3320_v22  ;;  %v1514_v60 = vrot.slane %v3320_v22, 7 }
0x1271   :  { %v2896_v23 = vpop.eup %2895 }
0x1272   :  { %1313 = vrot.lane.b32.xlu0 %v2896_v23, %s3005_s2 }
0x12cf   :  { %v1423_v24 = vpop.permute.xlu1 %1422 }
0x12d0   :  { %v3324_v25 = vmul.f32 %v2888_v1, %v1423_v24 }
0x12d2   :  { %v1534_v63 = vrot.slane %v3324_v25, 2 }
0x12d4   :  { %1535 = vrot.lane.b32.xlu1 %v1534_v63, %s3006_s20 }
0x12e4   :  { %v1314_v26 = vpop.permute.xlu0 %1313 }
0x12e5   :  { %v1316_v27 = vmul.f32 %v2892_v9, %v1314_v26 }
0x12e7   :  { %v1427_v28 = vrot.slane %v1316_v27, 5  ;;  %v3330_v29 = vsel %vm1864_vm7, %v3299_v45, %v1316_v27 }
0x12e9   :  { %1428 = vrot.lane.b32.xlu1 %v1427_v28, %s3007_s6 }
0x1346   :  { %v1536_v30 = vpop.permute.xlu1 %1535 }
0x1347   :  { %2763 = vmatmul.mubr.msk.f32.vlgmr.msra.gmra.mrb[14].mxu0 %vm129_vm3, %v1536_v30 }
0x1348   :  { %2771 = vmatpush3.msk.msra.mxu0 %vm133_vm2, %v3090_v3  ;;  %2772 = vmatprep.mubr.msk.f32.mxu0 %vm3000_vm1, %v2999_v2 }
0x1349   :  { %2780 = vmatprep.subr.mxu0 %v2999_v2 }
0x135b   :  { %v1429_v31 = vpop.permute.xlu1 %1428 }
0x135c   :  { %2758 = vmatmul.mubr.msk.f32.vlgmr.msra.gmra.mrb[12].mxu1 %vm129_vm3, %v1429_v31 }
0x135d   :  { %2766 = vmatpush3.msk.msra.mxu1 %vm133_vm2, %v3095_v4  ;;  %2767 = vmatprep.mubr.msk.f32.mxu1 %vm3000_vm1, %v2999_v2 }
0x135e   :  { %2775 = vmatprep.subr.mxu1 %v2999_v2 }
0x141a   :  { %v1605_v32 = vpop.f32.mrb[14].mxu0 }
0x141b   :  { %v1610_v34 = vrot.slane %v1605_v32, 7  ;;  %v2764_v35 = vpop.f32.mrb[15].mxu0 }
0x141d   :  { %1611 = vrot.lane.b32.xlu0 %v1610_v34, %s3002_s13 }
0x142f   :  { %v1498_v3 = vpop.f32.mrb[12].mxu1 }
0x1430   :  { %v2759_v37 = vpop.f32.mrb[13].mxu1  ;;  %v1503_v38 = vrot.slane %v1498_v3, 2 }
0x1432   :  { %v1505_v41 = vadd.f32 %v1503_v38, %v3134_v17 }
0x1434   :  { %v2637_v44 = vmul.f32 -1.442695, %v1505_v41 }
0x148f   :  { %v1612_v39 = vpop.permute.xlu0 %1611 }
0x1490   :  { %v1614_v40 = vadd.f32 %v1612_v39, %v3134_v17 }
0x1492   :  { %2897 = vtanh.f32 %v1614_v40  ;;  %v2640_v43 = vmul.f32 -1.442695, %v1614_v40 }
0x1493   :  { %2899 = vtanh.f32 %v1505_v41 }
0x1494   :  { %2901 = vpow2.f32 %v2640_v43 }
0x1495   :  { %2903 = vpow2.f32 %v2637_v44 }
0x149c   :  { %v2898_v4 = vpop.eup %2897 }
0x149d   :  { %1627 = vrot.lane.b32.xlu1 %v2898_v4, %s3003_s16  ;;  %v2900_v42 = vpop.eup %2899 }
0x149e   :  { %v2902_v45 = vpop.eup %2901 }
0x149f   :  { %v1618_v47 = vadd.f32 1.0, %v2902_v45  ;;  %v2904_v48 = vpop.eup %2903 }
0x14a0   :  { %v1509_v49 = vadd.f32 1.0, %v2904_v48  ;;  %v1877_v48 = vld [vmem:[%s3598_s7] sm:$0xf] }
0x14a1   :  { %1518 = vrot.lane.b32.xlu1 %v2900_v42, %s3003_s16  ;;  %2905 = vrcp.f32 %v1618_v47 }
0x14a2   :  { %2907 = vrcp.f32 %v1509_v49  ;;  %v1878_v49 = vld [vmem:[%s3598_s7 + $0x4] sm:$0xf] }
0x14ab   :  { %v2906_v50 = vpop.eup %2905 }
0x14ac   :  { %v2908_v53 = vpop.eup %2907  ;;  %v1625_v57 = vmul.f32 %v2906_v50, %v1623_v56 }
0x14ad   :  { %v1516_v62 = vmul.f32 %v2908_v53, %v1514_v60 }
0x150f   :  { %v1628_v51 = vpop.permute.xlu1 %1627 }
0x1510   :  { %v1630_v52 = vmul.f32 %v2906_v50, %v1628_v51 }
0x1512   :  { %1632 = vrot.lane.b32.xlu0 %v1630_v52, %s3004_s17 }
0x1513   :  { %v1519_v54 = vpop.permute.xlu1 %1518 }
0x1514   :  { %v1521_v55 = vmul.f32 %v2908_v53, %v1519_v54 }
0x1516   :  { %1523 = vrot.lane.b32.xlu0 %v1521_v55, %s3004_s17 }
0x1584   :  { %v1633_v59 = vpop.permute.xlu0 %1632 }
0x1585   :  { %v3354_v61 = vadd.f32 %v1633_v59, %v1625_v57 }
0x1587   :  { %2909 = vtanh.f32 %v3354_v61  ;;  %v1838_v43 = vrot.slane %v3354_v61, 1 }
0x1588   :  { %v1524_v0 = vpop.permute.xlu0 %1523 }
0x1589   :  { %v1526_v1 = vadd.f32 %v1524_v0, %v1516_v62 }
0x158b   :  { %2911 = vtanh.f32 %v1526_v1  ;;  %v1730_v39 = vrot.slane %v1526_v1, 7 }
0x1591   :  { %v2910_v5 = vpop.eup %2909 }
0x1592   :  { %1638 = vrot.lane.b32.xlu1 %v2910_v5, %s3005_s2 }
0x1595   :  { %v2912_v6 = vpop.eup %2911 }
0x1596   :  { %1529 = vrot.lane.b32.xlu0 %v2912_v6, %s3005_s2 }
0x1604   :  { %v1639_v7 = vpop.permute.xlu1 %1638 }
0x1605   :  { %v3359_v8 = vmul.f32 %v2906_v50, %v1639_v7 }
0x1607   :  { %v1750_v9 = vrot.slane %v3359_v8, 1 }
0x1608   :  { %v1530_v11 = vpop.permute.xlu0 %1529 }
0x1609   :  { %v1532_v12 = vmul.f32 %v2908_v53, %v1530_v11  ;;  %1751 = vrot.lane.b32.xlu1 %v1750_v9, %s3006_s20  ;;  %v3009_v9 = vmov 0  }
0x160a   :  { %2799 = vset.pattern.permute.xlu1 %v3009_v9  ;;  %2800 = vset.pattern.permute.xlu0 %v3009_v9 }
0x160b   :  { %v1643_v13 = vrot.slane %v1532_v12, 6  ;;  %v3365_v14 = vsel %vm1866_vm8, %v3330_v29, %v1532_v12 }
0x160d   :  { %1644 = vrot.lane.b32.xlu0 %v1643_v13, %s3007_s6  ;;  %v2651_v13 = vld [vmem:[%s3599_s8] ss:$0 sm:$0xff]  ;;  %s3010_s8 = smov [#allocation4]  }
0x160e   :  { %s2572_s27 = sshll.u32 %s3010_s8, 4  ;;  %s2573_s27 = int_to_ptr.vmem [resolvable:$true] %s2572_s27 }
0x160f   :  { %s2929_s28 = scalar_lea.vmem %s2573_s27, 16  ;;  %s2933_s3 = scalar_lea.vmem %s2573_s27, 32 }
0x1610   :  { %p2930_p0 = scmp.ne.s32.totalorder %s2573_s27, %s2929_s28  ;;  %p2934_p1 = scmp.lt.s32.totalorder %s2573_s27, %s2573_s27 }
0x1611   :  { %p2935_p2 = scmp.lt.s32.totalorder %s2933_s3, %s2929_s28 }
0x1613   :  { %p2936_p3 = por %p2935_p2, %p2934_p1 }
0x1615   :  { %p2937_p4 = pnand %p2936_p3, %p2930_p0 }
0x167b   :  { %v1752_v15 = vpop.permute.xlu1 %1751 }
0x167c   :  { %2773 = vmatmul.mubr.msk.f32.vlgmr.msra.gmra.mrb[16].mxu0 %vm129_vm3, %v1752_v15 }
0x167d   :  { %2782 = vmatprep.mubr.msk.f32.mxu0 %vm3000_vm1, %v2999_v2  ;;  %2781 = vmatpush3.msk.msra.mxu0 %vm133_vm2, %v1877_v48 }
0x167f   :  { %v1645_v16 = vpop.permute.xlu0 %1644 }
0x1680   :  { %2768 = vmatmul.mubr.msk.f32.vlgmr.msra.gmra.mrb[14].mxu1 %vm129_vm3, %v1645_v16 }
0x1681   :  { %2777 = vmatprep.mubr.msk.f32.mxu1 %vm3000_vm1, %v2999_v2  ;;  %2776 = vmatpush3.msk.msra.mxu1 %vm133_vm2, %v1878_v49 }
0x174f   :  { %v1821_v18 = vpop.f32.mrb[16].mxu0 }
0x1750   :  { %1826 = vrot.lane.b32.xlu1 %v1821_v18, %s3002_s13  ;;  %v2774_v19 = vpop.f32.mrb[17].mxu0 }
0x1753   :  { %v1714_v20 = vpop.f32.mrb[14].mxu1 }
0x1754   :  { %v1719_v21 = vrot.slane %v1714_v20, 1  ;;  %v2769_v22 = vpop.f32.mrb[15].mxu1 }
0x1756   :  { %v1721_v23 = vadd.f32 %v1719_v21, %v3134_v17 }
0x1758   :  { %2913 = vtanh.f32 %v1721_v23  ;;  %v2643_v63 = vmul.f32 -1.442695, %v1721_v23 }
0x175a   :  { %2915 = vpow2.f32 %v2643_v63 }
0x1762   :  { %v2914_v24 = vpop.eup %2913 }
0x1763   :  { %1734 = vrot.lane.b32.xlu1 %v2914_v24, %s3003_s16 }
0x1764   :  { %v2916_v28 = vpop.eup %2915 }
0x1765   :  { %v1725_v2 = vadd.f32 1.0, %v2916_v28 }
0x17c2   :  { %v1827_v26 = vpop.permute.xlu1 %1826 }
0x17c3   :  { %v1829_v27 = vadd.f32 %v1827_v26, %v3134_v17 }
0x17c5   :  { %2917 = vtanh.f32 %v1829_v27  ;;  %v2646_v34 = vmul.f32 -1.442695, %v1829_v27 }
0x17c6   :  { %2919 = vrcp.f32 %v1725_v2 }
0x17c7   :  { %2921 = vpow2.f32 %v2646_v34 }
0x17cf   :  { %v2918_v29 = vpop.eup %2917 }
0x17d0   :  { %1842 = vrot.lane.b32.xlu0 %v2918_v29, %s3003_s16  ;;  %v2920_v30 = vpop.eup %2919 }
0x17d1   :  { %v2922_v35 = vpop.eup %2921  ;;  %v1732_v40 = vmul.f32 %v2920_v30, %v1730_v39 }
0x17d2   :  { %v1833_v3 = vadd.f32 1.0, %v2922_v35 }
0x17d4   :  { %2923 = vrcp.f32 %v1833_v3 }
0x17d5   :  { %v1735_v31 = vpop.permute.xlu1 %1734 }
0x17d6   :  { %v1737_v32 = vmul.f32 %v2920_v30, %v1735_v31 }
0x17d8   :  { %1739 = vrot.lane.b32.xlu1 %v1737_v32, %s3004_s17 }
0x17de   :  { %v2924_v37 = vpop.eup %2923 }
0x17df   :  { %v1840_v44 = vmul.f32 %v2924_v37, %v1838_v43 }
0x1842   :  { %v1843_v38 = vpop.permute.xlu0 %1842 }
0x1843   :  { %v1845_v17 = vmul.f32 %v2924_v37, %v1843_v38 }
0x1845   :  { %1847 = vrot.lane.b32.xlu0 %v1845_v17, %s3004_s17 }
0x184a   :  { %v1740_v41 = vpop.permute.xlu1 %1739 }
0x184b   :  { %v1742_v4 = vadd.f32 %v1740_v41, %v1732_v40 }
0x184d   :  { %2925 = vtanh.f32 %v1742_v4 }
0x1857   :  { %v2926_v42 = vpop.eup %2925 }
0x1858   :  { %1745 = vrot.lane.b32.xlu1 %v2926_v42, %s3005_s2 }
0x18b7   :  { %v1848_v45 = vpop.permute.xlu0 %1847 }
0x18b8   :  { %v1850_v47 = vadd.f32 %v1848_v45, %v1840_v44 }
0x18ba   :  { %2927 = vtanh.f32 %v1850_v47 }
0x18c4   :  { %v2928_v50 = vpop.eup %2927 }
0x18c5   :  { %1853 = vrot.lane.b32.xlu0 %v2928_v50, %s3005_s2 }
0x18ca   :  { %v1746_v51 = vpop.permute.xlu1 %1745 }
0x18cb   :  { %v1748_v52 = vmul.f32 %v2920_v30, %v1746_v51 }
0x18cd   :  { %v1869_v53 = vsel %vm1868_vm9, %v3365_v14, %v1748_v52 }
0x18ce   :  { %1958 = vrot.lane.b32.xlu1 %v1869_v53, %s3007_s6 }
0x1937   :  { %v1854_v54 = vpop.permute.xlu0 %1853 }
0x1938   :  { %v1856_v55 = vmul.f32 %v2924_v37, %v1854_v54 }
0x193a   :  { %v1870_v56 = vsel %vm1857_vm4, %v1856_v55, %v3359_v8 }
0x193b   :  { %v1871_v57 = vsel %vm1859_vm5, %v1870_v56, %v3324_v25  ;;  %v2045_v25 = vlaneseq }
0x193c   :  { %v1872_v59 = vsel %vm1861_vm6, %v1871_v57, %v3286_v33 }
0x193d   :  { %v1873_v60 = vsel %vm133_vm2, %v1872_v59, %v3250_v46  ;;  %v3409_v5 = vand.u32 127, %v2045_v25  ;;  %v3414_v46 = vld [vmem:[%s3600_s9] sm:$0x1f]  ;;  %v3422_v11 = vshrl.u32 %v2045_v25, 7 }
0x193e   :  { %v1874_v61 = vsel %vm1864_vm7, %v1873_v60, %v3211_v58  ;;  %v3008_v58 = vmov -10000.0  }
0x193f   :  { %v1875_v62 = vsel %vm1866_vm8, %v1874_v61, %v3176_v10  ;;  %vm2048_vm10 = vcmp.eq.s32.totalorder %v3409_v5, 3  ;;  %v2103_v14 = vsub.s32 1, %v3422_v11  ;;  %v2058_v18 = vsub.s32 0, %v3422_v11 }
0x1940   :  { %v1959_v0 = vpop.permute.xlu1 %1958  ;;  %v1876_v1 = vsel %vm1868_vm9, %v1875_v62, %v3146_v36  ;;  %v2049_v10 = vsel %vm2048_vm10, 0.0, %v3008_v58  ;;  %v2145_v19 = vsub.s32 2, %v3422_v11  ;;  %v2187_v20 = vsub.s32 3, %v3422_v11 }
0x1941   :  { %1880 = vrot.lane.b32.xlu0 %v1876_v1, %s3006_s20  ;;  %2783 = vmatmul.mubr.msk.f32.vlgmr.msra.gmra.mrb[18].mxu0 %vm129_vm3, %v1959_v0  ;;  %v2050_v36 = vadd.f32 %v2049_v10, %v3414_v46  ;;  %v2271_v21 = vsub.s32 5, %v3422_v11  ;;  %v2313_v22 = vsub.s32 6, %v3422_v11  ;;  %v2355_v23 = vsub.s32 7, %v3422_v11 }
0x1942   :  { %v3438_v35 = vsub.s32 %v3409_v5, %v3422_v11  ;;  %v2229_v56 = vsub.s32 4, %v3422_v11  ;;  %vm2413_vm8 = vcmask 32768  }
0x1943   :  { %v2052_v33 = vsel %vm2051_vm11, %v2050_v36, -inf }
0x1960   :  { %2053 = vmax.xlane.f32.xlu0 %v2052_v33 }
0x19b3   :  { %v1881_v6 = vpop.permute.xlu0 %1880 }
0x19b4   :  { %2778 = vmatmul.mubr.msk.f32.vlgmr.msra.gmra.mrb[16].mxu1 %vm129_vm3, %v1881_v6 }
0x19ed   :  { %v2054_v31 = vpop.xlane.xlu0 %2053 }
0x1a14   :  { %v2031_v7 = vpop.f32.mrb[18].mxu0 }
0x1a15   :  { %v2784_v8 = vpop.f32.mrb[19].mxu0 }
0x1a87   :  { %v1953_v12 = vpop.f32.mrb[16].mxu1 }
0x1a88   :  { %v2032_v15 = vadd.f32 %v2031_v7, %v1953_v12  ;;  %v2779_v16 = vpop.f32.mrb[17].mxu1 }
0x1a8a   :  { %v2042_v24 = vadd.f32 %v2651_v13, %v2032_v15 }
0x1a8c   :  { %v2104_v63 = vrot.slane %v2042_v24, %v2103_v14  ;;  %v2059_v26 = vrot.slane %v2042_v24, %v2058_v18  ;;  %v2146_v27 = vrot.slane %v2042_v24, %v2145_v19  ;;  %v2188_v28 = vrot.slane %v2042_v24, %v2187_v20  ;;  %2044 = vst.msk [vmem:[#allocation2] sm:$0xff] %vm2043_vm12, %v2042_v24 }
0x1a8d   :  { %v2272_v2 = vrot.slane %v2042_v24, %v2271_v21  ;;  %v2314_v29 = vrot.slane %v2042_v24, %v2313_v22  ;;  %v3434_v30 = vrot.slane %v2042_v24, %v2355_v23  ;;  %v2230_v57 = vrot.slane %v2042_v24, %v2229_v56 }
0x1a8e   :  { %2106 = vbcast.lane.b32.xlu0 %v2104_v63, 256  ;;  %2061 = vbcast.lane.b32.xlu1 %v2059_v26, 256  ;;  %v2366_v18 = vrot.slane %v3414_v46, %v2229_v56 }
0x1b00   :  { %v2062_v32 = vpop.permute.xlu1 %2061  ;;  %v2107_v39 = vpop.permute.xlu0 %2106 }
0x1b01   :  { %v2064_v34 = vadd.f32 %v2062_v32, %v2054_v31 }
0x1b03   :  { %2067 = vperm.xlu1 %2799, %v2064_v34  }
0x1b82   :  { %v2068_v3 = vpop.permute.xlu1 %2067 }
0x1b83   :  { %v2072_v37 = vrot.slane %v2068_v3, %v3438_v35 }
0x1b85   :  { %v3442_v38 = vadd.f32 %v2072_v37, %v3414_v46 }
0x1b87   :  { %v2081_v17 = vsel %vm2051_vm11, %v3442_v38, -inf }
0x1b88   :  { %2082 = vmax.xlane.f32.xlu1 %v2081_v17 }
0x1c15   :  { %v3446_v40 = vpop.xlane.xlu1 %2082 }
0x1c16   :  { %v2109_v41 = vadd.f32 %v2107_v39, %v3446_v40 }
0x1c18   :  { %2112 = vperm.xlu1 %2799, %v2109_v41  }
0x1c1c   :  { %2148 = vbcast.lane.b32.xlu1 %v2146_v27, 256 }
0x1c97   :  { %v2113_v4 = vpop.permute.xlu1 %2112 }
0x1c98   :  { %v2117_v42 = vrot.slane %v2113_v4, %v3438_v35 }
0x1c9a   :  { %v3451_v43 = vadd.f32 %v2117_v42, %v3414_v46 }
0x1c9b   :  { %v2149_v45 = vpop.permute.xlu1 %2148 }
0x1c9c   :  { %v2123_v44 = vsel %vm2051_vm11, %v3451_v43, -inf }
0x1c9d   :  { %2124 = vmax.xlane.f32.xlu0 %v2123_v44 }
0x1cb3   :  { %2190 = vbcast.lane.b32.xlu0 %v2188_v28, 256 }
0x1d2a   :  { %v3455_v47 = vpop.xlane.xlu0 %2124 }
0x1d2b   :  { %v2151_v48 = vadd.f32 %v2149_v45, %v3455_v47 }
0x1d2d   :  { %2154 = vperm.xlu1 %2799, %v2151_v48  }
0x1d2e   :  { %v2191_v53 = vpop.permute.xlu0 %2190 }
0x1dac   :  { %v2155_v49 = vpop.permute.xlu1 %2154 }
0x1dad   :  { %v2159_v50 = vrot.slane %v2155_v49, %v3438_v35 }
0x1daf   :  { %v3460_v51 = vadd.f32 %v2159_v50, %v3414_v46 }
0x1db1   :  { %v2165_v52 = vsel %vm2051_vm11, %v3460_v51, -inf }
0x1db2   :  { %2166 = vmax.xlane.f32.xlu1 %v2165_v52 }
0x1e3f   :  { %v3464_v54 = vpop.xlane.xlu1 %2166 }
0x1e40   :  { %v2193_v55 = vadd.f32 %v2191_v53, %v3464_v54 }
0x1e42   :  { %2196 = vperm.xlu1 %2799, %v2193_v55  }
0x1e46   :  { %2232 = vbcast.lane.b32.xlu1 %v2230_v57, 256 }
0x1ec1   :  { %v2197_v59 = vpop.permute.xlu1 %2196 }
0x1ec2   :  { %v2201_v60 = vrot.slane %v2197_v59, %v3438_v35 }
0x1ec4   :  { %v3470_v61 = vadd.f32 %v2201_v60, %v3414_v46 }
0x1ec5   :  { %v2233_v0 = vpop.permute.xlu1 %2232 }
0x1ec6   :  { %v2207_v62 = vsel %vm2051_vm11, %v3470_v61, -inf }
0x1ec7   :  { %2208 = vmax.xlane.f32.xlu0 %v2207_v62 }
0x1edd   :  { %2274 = vbcast.lane.b32.xlu0 %v2272_v2, 256 }
0x1f54   :  { %v3474_v1 = vpop.xlane.xlu0 %2208 }
0x1f55   :  { %v2235_v25 = vadd.f32 %v2233_v0, %v3474_v1 }
0x1f57   :  { %2238 = vperm.xlu1 %2799, %v2235_v25  }
0x1f58   :  { %v2275_v6 = vpop.permute.xlu0 %2274 }
0x1fd6   :  { %v2239_v58 = vpop.permute.xlu1 %2238 }
0x1fd7   :  { %v2243_v10 = vrot.slane %v2239_v58, %v3438_v35 }
0x1fd9   :  { %v3479_v36 = vadd.f32 %v2243_v10, %v3414_v46 }
0x1fdb   :  { %v2249_v33 = vsel %vm2051_vm11, %v3479_v36, -inf }
0x1fdc   :  { %2250 = vmax.xlane.f32.xlu1 %v2249_v33 }
0x2069   :  { %v3483_v7 = vpop.xlane.xlu1 %2250 }
0x206a   :  { %v2277_v8 = vadd.f32 %v2275_v6, %v3483_v7  ;;  %vm2252_vm7 = vcmp.eq.f32.partialorder %v3479_v36, %v3483_v7 }
0x206c   :  { %2280 = vperm.xlu0 %2800, %v2277_v8  }
0x2070   :  { %2316 = vbcast.lane.b32.xlu0 %v2314_v29, 256 }
0x20eb   :  { %v2281_v9 = vpop.permute.xlu0 %2280 }
0x20ec   :  { %v2285_v11 = vrot.slane %v2281_v9, %v3438_v35 }
0x20ee   :  { %v2290_v12 = vadd.f32 %v2285_v11, %v3414_v46 }
0x20ef   :  { %v2317_v14 = vpop.permute.xlu0 %2316 }
0x20f0   :  { %v2291_v13 = vsel %vm2051_vm11, %v2290_v12, -inf }
0x20f1   :  { %2292 = vmax.xlane.f32.xlu1 %v2291_v13 }
0x217e   :  { %v2293_v15 = vpop.xlane.xlu1 %2292 }
0x217f   :  { %v2319_v16 = vadd.f32 %v2317_v14, %v2293_v15  ;;  %vm2294_vm13 = vcmp.eq.f32.partialorder %v2290_v12, %v2293_v15  ;;  %v2253_v14 = vsel %vm2252_vm7, %v3409_v5, 5  ;;  %vm2469_vm7 = vcmp.eq.s32.totalorder %v3409_v5, 4 }
0x2180   :  { %v2295_v24 = vsel %vm2294_vm13, %v3409_v5, 5  ;;  %vm2210_vm13 = vcmp.eq.f32.partialorder %v3470_v61, %v3474_v1 }
0x2181   :  { %2322 = vperm.xlu1 %2799, %v2319_v16   ;;  %v2296_v2 = vsel %vm2051_vm11, %v2295_v24, 2147483647 }
0x2182   :  { %v2298_v3 = vshra.s32 %v2296_v2, 16  ;;  %v2297_v52 = vand.u32 65535, %v2296_v2 }
0x2184   :  { %v2300_v39 = vcvt.s32.f32 %v2298_v3  ;;  %v2299_v60 = vcvt.s32.f32 %v2297_v52 }
0x2185   :  { %2358 = vbcast.lane.b32.xlu1 %v3434_v30, 256 }
0x2189   :  { %2368 = vbcast.lane.b32.xlu1 %v2366_v18, 256  ;;  %v2254_v18 = vsel %vm2051_vm11, %v2253_v14, 2147483647 }
0x218a   :  { %v2256_v7 = vshra.s32 %v2254_v18, 16 }
0x2200   :  { %v2323_v19 = vpop.permute.xlu1 %2322 }
0x2201   :  { %v2327_v20 = vrot.slane %v2323_v19, %v3438_v35 }
0x2203   :  { %v2332_v21 = vadd.f32 %v2327_v20, %v3414_v46 }
0x2204   :  { %v2359_v23 = vpop.permute.xlu1 %2358 }
0x2205   :  { %v2333_v22 = vsel %vm2051_vm11, %v2332_v21, -inf }
0x2206   :  { %2334 = vmax.xlane.f32.xlu0 %v2333_v22 }
0x2208   :  { %v2369_v26 = vpop.permute.xlu1 %2368 }
0x2293   :  { %v2335_v63 = vpop.xlane.xlu0 %2334 }
0x2294   :  { %vm2336_vm14 = vcmp.eq.f32.partialorder %v2332_v21, %v2335_v63  ;;  %v2361_v27 = vadd.f32 %v2359_v23, %v2335_v63  ;;  %v2258_v23 = vcvt.s32.f32 %v2256_v7 }
0x2295   :  { %v2337_v28 = vsel %vm2336_vm14, %v3409_v5, 5 }
0x2296   :  { %v2338_v29 = vsel %vm2051_vm11, %v2337_v28, 2147483647  ;;  %v2371_v30 = vadd.f32 %v2369_v26, %v2361_v27 }
0x2297   :  { %v2340_v46 = vshra.s32 %v2338_v29, 16  ;;  %v2339_v45 = vand.u32 65535, %v2338_v29  ;;  %v2255_v29 = vand.u32 65535, %v2254_v18 }
0x2298   :  { %v2373_v31 = vsel %vm2372_vm15, %v2371_v30, -inf }
0x2299   :  { %v2374_v32 = vrot.slane %v2373_v31, 4  ;;  %v2342_v34 = vcvt.s32.f32 %v2340_v46  ;;  %v2341_v50 = vcvt.s32.f32 %v2339_v45  ;;  %v2257_v3 = vcvt.s32.f32 %v2255_v29 }
0x229b   :  { %v2375_v37 = vmax.f32 %v2373_v31, %v2374_v32  ;;  %2343 = vmin.xlane.f32.xlu1 %v2342_v34 }
0x229d   :  { %v2376_v17 = vrot.slane %v2375_v37, 2 }
0x229f   :  { %v2377_v41 = vmax.f32 %v2375_v37, %v2376_v17  ;;  %2301 = vmin.xlane.f32.xlu1 %v2300_v39 }
0x22a1   :  { %v2378_v4 = vrot.slane %v2377_v41, 1 }
0x22a3   :  { %v2379_v42 = vmax.f32 %v2377_v41, %v2378_v4 }
0x22a5   :  { %2382 = vperm.xlu0 %2800, %v2379_v42   ;;  %2401 = vst.msk [vmem:[#allocation4] sm:$0x1] %vm2400_vm0, %v2379_v42  ;;  %v2211_v42 = vsel %vm2210_vm13, %v3409_v5, 5  ;;  %vm2402_vm0 = vcmp.eq.s32.totalorder %v3409_v5, 7 }
0x22a9   :  { %2387 = vbcast.lane.b32.xlu0 %v3409_v5, 256 }
0x2324   :  { %v2383_v44 = vpop.permute.xlu0 %2382 }
0x2325   :  { %vm2385_vm1 = vcmp.eq.f32.partialorder %v2371_v30, %v2383_v44 }
0x2328   :  { %v2388_v48 = vpop.permute.xlu0 %2387  ;;  %v2344_v49 = vpop.xlane.xlu1 %2343 }
0x2329   :  { %v2389_v53 = vsel %vm2385_vm1, %v2388_v48, 5  ;;  %vm2345_vm2 = vcmp.eq.f32.partialorder %v2342_v34, %v2344_v49  ;;  %v2350_v6 = vcvt.f32.s32 %v2344_v49  ;;  %v2212_v49 = vsel %vm2051_vm11, %v2211_v42, 2147483647 }
0x232a   :  { %v2390_v55 = vsel %vm2372_vm15, %v2389_v53, 2147483647  ;;  %v2346_v56 = vsel %vm2345_vm2, %v2341_v50, inf  ;;  %v2214_v52 = vshra.s32 %v2212_v49, 16  ;;  %vm2168_vm15 = vcmp.eq.f32.partialorder %v3460_v51, %v3464_v54 }
0x232b   :  { %v2391_v57 = vrot.slane %v2390_v55, 4  ;;  %2347 = vmin.xlane.f32.xlu0 %v2346_v56  ;;  %v2351_v9 = vshll.u32 %v2350_v6, 16  ;;  %vm2427_vm1 = vcmp.eq.s32.totalorder %v3409_v5, 6  ;;  %vm2448_vm2 = vcmp.eq.s32.totalorder %v3409_v5, 5 }
0x232c   :  { %v2302_v59 = vpop.xlane.xlu1 %2301  ;;  %v2216_v53 = vcvt.s32.f32 %v2214_v52 }
0x232d   :  { %vm2392_vm3 = vcmp.lt.s32.totalorder %v2390_v55, %v2391_v57  ;;  %vm2303_vm4 = vcmp.eq.f32.partialorder %v2300_v39, %v2302_v59  ;;  %v2308_v63 = vcvt.f32.s32 %v2302_v59 }
0x232e   :  { %v2393_v62 = vsel %vm2392_vm3, %v2390_v55, %v2391_v57  ;;  %v2304_v0 = vsel %vm2303_vm4, %v2299_v60, inf  ;;  %v2169_v60 = vsel %vm2168_vm15, %v3409_v5, 5 }
0x232f   :  { %v2394_v25 = vrot.slane %v2393_v62, 2  ;;  %2305 = vmin.xlane.f32.xlu0 %v2304_v0  ;;  %v2309_v27 = vshll.u32 %v2308_v63, 16 }
0x2331   :  { %vm2395_vm5 = vcmp.lt.s32.totalorder %v2393_v62, %v2394_v25 }
0x2332   :  { %v2396_v58 = vsel %vm2395_vm5, %v2393_v62, %v2394_v25  ;;  %v2213_v25 = vand.u32 65535, %v2212_v49  ;;  %vm2126_vm5 = vcmp.eq.f32.partialorder %v3451_v43, %v3455_v47 }
0x2333   :  { %v2397_v10 = vrot.slane %v2396_v58, 1 }
0x2335   :  { %vm2398_vm6 = vcmp.lt.s32.totalorder %v2396_v58, %v2397_v10 }
0x2336   :  { %v2399_v33 = vsel %vm2398_vm6, %v2396_v58, %v2397_v10 }
0x2337   :  { %2404 = vperm.xlu1 %2799, %v2399_v33   ;;  %v2170_v33 = vsel %vm2051_vm11, %v2169_v60, 2147483647 }
0x2338   :  { %v2172_v14 = vshra.s32 %v2170_v33, 16 }
0x23b6   :  { %v3503_v12 = vpop.permute.xlu1 %2404 }
0x23b7   :  { %vm2407_vm9 = vcmp.eq.s32.totalorder %v3409_v5, %v3503_v12  ;;  %v2406_v51 = vsel %vm2402_vm0, %v3503_v12, 0  ;;  %vm2531_vm0 = vcmp.eq.s32.totalorder %v3409_v5, 1 }
0x23b8   :  { %v2348_v8 = vpop.xlane.xlu0 %2347 }
0x23b9   :  { %v2349_v11 = vcvt.f32.s32 %v2348_v8 }
0x23bb   :  { %v2352_v13 = vadd.s32 %v2351_v9, %v2349_v11  ;;  %v2215_v11 = vcvt.s32.f32 %v2213_v25 }
0x23bc   :  { %v2306_v24 = vpop.xlane.xlu0 %2305 }
0x23bd   :  { %v2411_v15 = vrot.slane %v2352_v13, %v3438_v35  ;;  %v2307_v26 = vcvt.f32.s32 %v2306_v24 }
0x23bf   :  { %v2412_v16 = vsel %vm2407_vm9, %v2411_v15, 0  ;;  %v2310_v46 = vadd.s32 %v2309_v27, %v2307_v26 }
0x23c0   :  { %v2414_v19 = vsel %vm2413_vm8, %v2412_v16, 0 }
0x23c1   :  { %v2416_v20 = vshrl.u32 %v2414_v19, 16  ;;  %v2415_v21 = vand.u32 65535, %v2414_v19  ;;  %v2433_v17 = vrot.slane %v2310_v46, %v3438_v35 }
0x23c3   :  { %v2418_v22 = vcvt.s32.f32 %v2416_v20  ;;  %v2417_v36 = vcvt.s32.f32 %v2415_v21  ;;  %v2174_v20 = vcvt.s32.f32 %v2172_v14 }
0x23c5   :  { %2421 = vadd.xlane.f32.xlu1 %v2418_v22  ;;  %2419 = vadd.xlane.f32.xlu0 %v2417_v36  ;;  %v2127_v36 = vsel %vm2126_vm5, %v3409_v5, 5 }
0x23c6   :  { %v2128_v24 = vsel %vm2051_vm11, %v2127_v36, 2147483647 }
0x23c7   :  { %v2130_v29 = vshra.s32 %v2128_v24, 16  ;;  %v2129_v52 = vand.u32 65535, %v2128_v24 }
0x23c9   :  { %2259 = vmin.xlane.f32.xlu0 %v2258_v23  ;;  %v2132_v43 = vcvt.s32.f32 %v2130_v29 }
0x2452   :  { %v2422_v28 = vpop.xlane.xlu1 %2421  ;;  %v2420_v2 = vpop.xlane.xlu0 %2419 }
0x2453   :  { %v2424_v30 = vcvt.f32.s32 %v2422_v28  ;;  %v2423_v32 = vcvt.f32.s32 %v2420_v2 }
0x2455   :  { %v2425_v31 = vshll.u32 %v2424_v30, 16 }
0x2456   :  { %v2260_v34 = vpop.xlane.xlu0 %2259 }
0x2457   :  { %v2426_v37 = vadd.s32 %v2425_v31, %v2423_v32  ;;  %vm2261_vm12 = vcmp.eq.f32.partialorder %v2258_v23, %v2260_v34  ;;  %v2266_v1 = vcvt.f32.s32 %v2260_v34  ;;  %v2171_v23 = vand.u32 65535, %v2170_v33 }
0x2458   :  { %v2262_v39 = vsel %vm2261_vm12, %v2257_v3, inf  ;;  %vm2084_vm12 = vcmp.eq.f32.partialorder %v3442_v38, %v3446_v40 }
0x2459   :  { %vm2429_vm14 = vcmp.eq.s32.totalorder %v3409_v5, %v2426_v37  ;;  %2263 = vmin.xlane.f32.xlu0 %v2262_v39  ;;  %v2267_v59 = vshll.u32 %v2266_v1, 16  ;;  %v2428_v6 = vsel %vm2427_vm1, %v2426_v37, %v2406_v51  ;;  %v2173_v27 = vcvt.s32.f32 %v2171_v23 }
0x245a   :  { %v2434_v41 = vsel %vm2429_vm14, %v2433_v17, 0  ;;  %v2085_v49 = vsel %vm2084_vm12, %v3409_v5, 5  ;;  %v2131_v1 = vcvt.s32.f32 %v2129_v52 }
0x245b   :  { %v2435_v4 = vsel %vm2413_vm8, %v2434_v41, 0 }
0x245c   :  { %v2437_v44 = vshrl.u32 %v2435_v4, 16  ;;  %v2436_v48 = vand.u32 65535, %v2435_v4 }
0x245e   :  { %v2439_v45 = vcvt.s32.f32 %v2437_v44  ;;  %v2438_v50 = vcvt.s32.f32 %v2436_v48 }
0x2460   :  { %2442 = vadd.xlane.f32.xlu0 %v2439_v45 }
0x2464   :  { %2440 = vadd.xlane.f32.xlu0 %v2438_v50 }
0x2468   :  { %2217 = vmin.xlane.f32.xlu0 %v2216_v53 }
0x24e6   :  { %v2264_v61 = vpop.xlane.xlu0 %2263 }
0x24e7   :  { %v2265_v55 = vcvt.f32.s32 %v2264_v61 }
0x24e9   :  { %v2268_v62 = vadd.s32 %v2267_v59, %v2265_v55 }
0x24eb   :  { %v2454_v8 = vrot.slane %v2268_v62, %v3438_v35 }
0x24ed   :  { %v2443_v56 = vpop.xlane.xlu0 %2442 }
0x24ee   :  { %v2445_v57 = vcvt.f32.s32 %v2443_v56 }
0x24f0   :  { %v2446_v58 = vshll.u32 %v2445_v57, 16 }
0x24f1   :  { %v2441_v0 = vpop.xlane.xlu0 %2440 }
0x24f2   :  { %v2444_v10 = vcvt.f32.s32 %v2441_v0 }
0x24f4   :  { %v2447_v54 = vadd.s32 %v2446_v58, %v2444_v10 }
0x24f5   :  { %v2218_v9 = vpop.xlane.xlu0 %2217 }
0x24f6   :  { %v2449_v13 = vsel %vm2448_vm2, %v2447_v54, %v2428_v6  ;;  %vm2450_vm3 = vcmp.eq.s32.totalorder %v3409_v5, %v2447_v54  ;;  %vm2219_vm4 = vcmp.eq.f32.partialorder %v2216_v53, %v2218_v9  ;;  %v2224_v63 = vcvt.f32.s32 %v2218_v9 }
0x24f7   :  { %v2455_v15 = vsel %vm2450_vm3, %v2454_v8, 0  ;;  %v2220_v16 = vsel %vm2219_vm4, %v2215_v11, inf  ;;  %v2086_v53 = vsel %vm2051_vm11, %v2085_v49, 2147483647 }
0x24f8   :  { %2221 = vmin.xlane.f32.xlu1 %v2220_v16  ;;  %v2456_v18 = vsel %vm2413_vm8, %v2455_v15, 0  ;;  %v2225_v31 = vshll.u32 %v2224_v63, 16  ;;  %v2088_v55 = vshra.s32 %v2086_v53, 16  ;;  %v2087_v16 = vand.u32 65535, %v2086_v53 }
0x24f9   :  { %v2458_v19 = vshrl.u32 %v2456_v18, 16  ;;  %v2457_v12 = vand.u32 65535, %v2456_v18 }
0x24fa   :  { %v2090_v57 = vcvt.s32.f32 %v2088_v55 }
0x24fb   :  { %v2460_v21 = vcvt.s32.f32 %v2458_v19  ;;  %v2459_v22 = vcvt.s32.f32 %v2457_v12  ;;  %v2089_v19 = vcvt.s32.f32 %v2087_v16 }
0x24fc   :  { %2175 = vmin.xlane.f32.xlu1 %v2174_v20 }
0x24fd   :  { %2463 = vadd.xlane.f32.xlu0 %v2460_v21 }
0x2501   :  { %2461 = vadd.xlane.f32.xlu0 %v2459_v22 }
0x2585   :  { %v2222_v7 = vpop.xlane.xlu1 %2221 }
0x2586   :  { %v2223_v28 = vcvt.f32.s32 %v2222_v7 }
0x2588   :  { %v2226_v32 = vadd.s32 %v2225_v31, %v2223_v28 }
0x2589   :  { %v2176_v26 = vpop.xlane.xlu1 %2175 }
0x258a   :  { %vm2177_vm6 = vcmp.eq.f32.partialorder %v2174_v20, %v2176_v26  ;;  %v2464_v2 = vpop.xlane.xlu0 %2463  ;;  %v2475_v17 = vrot.slane %v2226_v32, %v3438_v35  ;;  %v2182_v59 = vcvt.f32.s32 %v2176_v26 }
0x258b   :  { %v2466_v30 = vcvt.f32.s32 %v2464_v2  ;;  %v2178_v46 = vsel %vm2177_vm6, %v2173_v27, inf }
0x258c   :  { %2179 = vmin.xlane.f32.xlu1 %v2178_v46  ;;  %v2183_v25 = vshll.u32 %v2182_v59, 16 }
0x258d   :  { %v2467_v47 = vshll.u32 %v2466_v30, 16 }
0x258e   :  { %v2462_v34 = vpop.xlane.xlu0 %2461 }
0x258f   :  { %v2465_v3 = vcvt.f32.s32 %v2462_v34 }
0x2590   :  { %2133 = vmin.xlane.f32.xlu1 %v2132_v43 }
0x2591   :  { %v2468_v37 = vadd.s32 %v2467_v47, %v2465_v3 }
0x2593   :  { %v2470_v39 = vsel %vm2469_vm7, %v2468_v37, %v2449_v13  ;;  %vm2471_vm9 = vcmp.eq.s32.totalorder %v3409_v5, %v2468_v37 }
0x2594   :  { %v2476_v41 = vsel %vm2471_vm9, %v2475_v17, 0 }
0x2595   :  { %v2477_v4 = vsel %vm2413_vm8, %v2476_v41, 0 }
0x2596   :  { %v2479_v42 = vshrl.u32 %v2477_v4, 16  ;;  %v2478_v45 = vand.u32 65535, %v2477_v4 }
0x2598   :  { %v2481_v44 = vcvt.s32.f32 %v2479_v42  ;;  %v2480_v48 = vcvt.s32.f32 %v2478_v45 }
0x259a   :  { %2484 = vadd.xlane.f32.xlu0 %v2481_v44 }
0x259e   :  { %2482 = vadd.xlane.f32.xlu0 %v2480_v48 }
0x2619   :  { %v2180_v50 = vpop.xlane.xlu1 %2179 }
0x261a   :  { %v2181_v60 = vcvt.f32.s32 %v2180_v50 }
0x261c   :  { %v2184_v38 = vadd.s32 %v2183_v25, %v2181_v60 }
0x261d   :  { %v2134_v61 = vpop.xlane.xlu1 %2133 }
0x261e   :  { %vm2135_vm13 = vcmp.eq.f32.partialorder %v2132_v43, %v2134_v61  ;;  %v2495_v51 = vrot.slane %v2184_v38, %v3438_v35  ;;  %v2140_v21 = vcvt.f32.s32 %v2134_v61 }
0x261f   :  { %v2136_v56 = vsel %vm2135_vm13, %v2131_v1, inf }
0x2620   :  { %2137 = vmin.xlane.f32.xlu1 %v2136_v56  ;;  %v2141_v7 = vshll.u32 %v2140_v21, 16 }
0x2624   :  { %2091 = vmin.xlane.f32.xlu1 %v2090_v57 }
0x2627   :  { %v2485_v62 = vpop.xlane.xlu0 %2484 }
0x2628   :  { %v2487_v0 = vcvt.f32.s32 %v2485_v62 }
0x262a   :  { %v2488_v58 = vshll.u32 %v2487_v0, 16 }
0x262b   :  { %v2483_v40 = vpop.xlane.xlu0 %2482 }
0x262c   :  { %v2486_v10 = vcvt.f32.s32 %v2483_v40 }
0x262e   :  { %v2489_v33 = vadd.s32 %v2488_v58, %v2486_v10 }
0x2630   :  { %v2490_v54 = vsel %vm2048_vm10, %v2489_v33, %v2470_v39  ;;  %vm2491_vm11 = vcmp.eq.s32.totalorder %v3409_v5, %v2489_v33  ;;  %vm2510_vm10 = vcmp.eq.s32.totalorder %v3409_v5, 2 }
0x2631   :  { %v2496_v6 = vsel %vm2491_vm11, %v2495_v51, 0 }
0x2632   :  { %v2497_v8 = vsel %vm2413_vm8, %v2496_v6, 0 }
0x2633   :  { %v2499_v9 = vshrl.u32 %v2497_v8, 16  ;;  %v2498_v13 = vand.u32 65535, %v2497_v8 }
0x2635   :  { %v2501_v11 = vcvt.s32.f32 %v2499_v9  ;;  %v2500_v14 = vcvt.s32.f32 %v2498_v13 }
0x2637   :  { %2504 = vadd.xlane.f32.xlu0 %v2501_v11 }
0x263b   :  { %2502 = vadd.xlane.f32.xlu0 %v2500_v14 }
0x26ad   :  { %v2138_v15 = vpop.xlane.xlu1 %2137 }
0x26ae   :  { %v2139_v12 = vcvt.f32.s32 %v2138_v15 }
0x26b0   :  { %v2142_v23 = vadd.s32 %v2141_v7, %v2139_v12 }
0x26b1   :  { %v2092_v18 = vpop.xlane.xlu1 %2091 }
0x26b2   :  { %vm2093_vm14 = vcmp.eq.f32.partialorder %v2090_v57, %v2092_v18  ;;  %v2516_v28 = vrot.slane %v2142_v23, %v3438_v35  ;;  %v2098_v47 = vcvt.f32.s32 %v2092_v18 }
0x26b3   :  { %v2094_v20 = vsel %vm2093_vm14, %v2089_v19, inf }
0x26b4   :  { %2095 = vmin.xlane.f32.xlu1 %v2094_v20  ;;  %v2099_v39 = vshll.u32 %v2098_v47, 16 }
0x26c4   :  { %v2505_v22 = vpop.xlane.xlu0 %2504 }
0x26c5   :  { %v2507_v36 = vcvt.f32.s32 %v2505_v22 }
0x26c7   :  { %v2508_v63 = vshll.u32 %v2507_v36, 16 }
0x26c8   :  { %v2503_v24 = vpop.xlane.xlu0 %2502 }
0x26c9   :  { %v2506_v26 = vcvt.f32.s32 %v2503_v24 }
0x26cb   :  { %v2509_v27 = vadd.s32 %v2508_v63, %v2506_v26 }
0x26cd   :  { %v2511_v2 = vsel %vm2510_vm10, %v2509_v27, %v2490_v54  ;;  %vm2512_vm15 = vcmp.eq.s32.totalorder %v3409_v5, %v2509_v27 }
0x26ce   :  { %v2517_v29 = vsel %vm2512_vm15, %v2516_v28, 0 }
0x26cf   :  { %v2518_v30 = vsel %vm2413_vm8, %v2517_v29, 0 }
0x26d0   :  { %v2520_v46 = vshrl.u32 %v2518_v30, 16  ;;  %v2519_v32 = vand.u32 65535, %v2518_v30 }
0x26d2   :  { %v2522_v31 = vcvt.s32.f32 %v2520_v46  ;;  %v2521_v34 = vcvt.s32.f32 %v2519_v32 }
0x26d4   :  { %2525 = vadd.xlane.f32.xlu0 %v2522_v31 }
0x26d8   :  { %2523 = vadd.xlane.f32.xlu0 %v2521_v34 }
0x2741   :  { %v2096_v43 = vpop.xlane.xlu1 %2095 }
0x2742   :  { %v2097_v3 = vcvt.f32.s32 %v2096_v43 }
0x2744   :  { %v2100_v41 = vadd.s32 %v2099_v39, %v2097_v3 }
0x2746   :  { %v2537_v48 = vrot.slane %v2100_v41, %v3438_v35 }
0x2761   :  { %v2526_v37 = vpop.xlane.xlu0 %2525 }
0x2762   :  { %v2528_v17 = vcvt.f32.s32 %v2526_v37 }
0x2764   :  { %v2529_v42 = vshll.u32 %v2528_v17, 16 }
0x2765   :  { %v2524_v4 = vpop.xlane.xlu0 %2523 }
0x2766   :  { %v2527_v44 = vcvt.f32.s32 %v2524_v4 }
0x2768   :  { %v2530_v45 = vadd.s32 %v2529_v42, %v2527_v44 }
0x276a   :  { %vm2533_vm1 = vcmp.eq.s32.totalorder %v3409_v5, %v2530_v45  ;;  %v2532_v49 = vsel %vm2531_vm0, %v2530_v45, %v2511_v2 }
0x276b   :  { %v2538_v50 = vsel %vm2533_vm1, %v2537_v48, 0 }
0x276c   :  { %v2539_v52 = vsel %vm2413_vm8, %v2538_v50, 0 }
0x276d   :  { %v2541_v53 = vshrl.u32 %v2539_v52, 16  ;;  %v2540_v61 = vand.u32 65535, %v2539_v52 }
0x276f   :  { %v2543_v1 = vcvt.s32.f32 %v2541_v53  ;;  %v2542_v55 = vcvt.s32.f32 %v2540_v61 }
0x2771   :  { %2546 = vadd.xlane.f32.xlu1 %v2543_v1  ;;  %2544 = vadd.xlane.f32.xlu0 %v2542_v55 }
0x2772   :  { %2940 = shalt.err (!%p2937_p4)
}
0x2773   :  { %s2941_s29 = scalar_lea.hbm %s3602_s11, 16 }
0x2774   :  { %p2942_p5 = scmp.ne.s32.totalorder %s3602_s11, %s2941_s29  ;;  %p2945_p6 = scmp.lt.u32.totalorder %s2941_s29, %s3602_s11 }
0x2776   :  { %p2947_p7 = pnand %p2945_p6, %p2942_p5 }
0x2778   :  { %2950 = shalt.err (!%p2947_p7)
}
0x2779   :  { %2575 = dma.vmem_to_hbm [thread:$0]  %s2573_s27, 16, %s3602_s11, [#allocation5]  }
0x277a   :  { %s2951_s2 = scalar_lea.vmem %s2563_s0, 128  ;;  %p2956_p9 = scmp.lt.s32.totalorder %s2563_s0, %s2563_s0 }
0x277b   :  { %p2952_p8 = scmp.ne.s32.totalorder %s2563_s0, %s2951_s2  ;;  %p2957_p10 = scmp.lt.s32.totalorder %s2951_s2, %s2951_s2 }
0x277d   :  { %p2958_p11 = por %p2957_p10, %p2956_p9 }
0x277f   :  { %p2959_p12 = pnand %p2958_p11, %p2952_p8 }
0x2781   :  { %2962 = shalt.err (!%p2959_p12)
}
0x2782   :  { %s2963_s20 = scalar_lea.hbm %s3601_s10, 128 }
0x2783   :  { %p2964_p13 = scmp.ne.s32.totalorder %s3601_s10, %s2963_s20  ;;  %p2967_p0 = scmp.lt.u32.totalorder %s2963_s20, %s3601_s10 }
0x2785   :  { %p2969_p1 = pnand %p2967_p0, %p2964_p13 }
0x2787   :  { %2972 = shalt.err (!%p2969_p1)
}
0x2788   :  { %2565 = dma.vmem_to_hbm [thread:$0]  %s2563_s0, 128, %s3601_s10, [#allocation3]   ;;  %vm2552_vm8 = vcmp.eq.s32.totalorder %v3409_v5, 0  ;;  %vm2554_vm2 = vcmask 57344  }
0x2789   :  { %s3012_s7 = smov [#allocation6]  }
0x278a   :  { %s2582_s25 = sshll.u32 %s3012_s7, 4  ;;  %s2583_s25 = int_to_ptr.vmem [resolvable:$true] %s2582_s25 }
0x278b   :  { %s2973_s9 = scalar_lea.vmem %s2583_s25, 16  ;;  %s2977_s26 = scalar_lea.vmem %s2583_s25, 32 }
0x278c   :  { %p2974_p2 = scmp.ne.s32.totalorder %s2583_s25, %s2973_s9  ;;  %p2978_p3 = scmp.lt.s32.totalorder %s2583_s25, %s2583_s25 }
0x278d   :  { %p2979_p4 = scmp.lt.s32.totalorder %s2977_s26, %s2973_s9 }
0x278f   :  { %p2980_p5 = por %p2979_p4, %p2978_p3 }
0x2791   :  { %p2981_p6 = pnand %p2980_p5, %p2974_p2 }
0x27fe   :  { %v2547_v35 = vpop.xlane.xlu1 %2546  ;;  %v2545_v56 = vpop.xlane.xlu0 %2544 }
0x27ff   :  { %v2549_v57 = vcvt.f32.s32 %v2547_v35  ;;  %v2548_v60 = vcvt.f32.s32 %v2545_v56 }
0x2801   :  { %v2550_v59 = vshll.u32 %v2549_v57, 16 }
0x2803   :  { %v2551_v62 = vadd.s32 %v2550_v59, %v2548_v60 }
0x2805   :  { %v2553_v0 = vsel %vm2552_vm8, %v2551_v62, %v2532_v49 }
0x2806   :  { %2555 = vst.msk [vmem:[#allocation6] sm:$0x1] %vm2554_vm2, %v2553_v0 }
0x2807   :  { %2984 = shalt.err (!%p2981_p6)
}
0x2808   :  { %s2985_s27 = scalar_lea.hbm %s3603_s12, 16 }
0x2809   :  { %p2986_p7 = scmp.ne.s32.totalorder %s3603_s12, %s2985_s27  ;;  %p2989_p8 = scmp.lt.u32.totalorder %s2985_s27, %s3603_s12 }
0x280b   :  { %p2991_p9 = pnand %p2989_p8, %p2986_p7 }
0x280d   :  { %2994 = shalt.err (!%p2991_p9)
}
0x280e   :  { %2585 = dma.vmem_to_hbm [thread:$0]  %s2583_s25, 16, %s3603_s12, [#allocation5]  }
0x280f   :  { %2995 = dma.done.wait [#allocation3], 128  }
0x2810   :  { %2996 = vsyncadd [#allocation3], 4294967168 }
0x2811   :  { %2997 = dma.done.wait [#allocation5], 32  }
0x2812   :  { %2998 = vsyncadd [#allocation5], 4294967264 }
0x2813   :  { %2595 = vsyncpa [#allocation3], 1 }
0x2814   :  { %2596 = vsyncpa [#allocation5], 1 }

</bundles_post_ra>
